<compile_context>
chip_gen: v5e
topology: v5e:2x2
jax: 0.10.0
libtpu: 0.0.40
codegen_flags: <defaults>
</compile_context>

<pallas_src>
import functools

import numpy as np
import jax
import jax.numpy as jnp
from jax import lax
from jax.experimental import pallas as pl
from jax.experimental.pallas import tpu as pltpu

ALPHA = 0.0002
HUBER_EPS = 0.01
FC_PAD = 128          # fc head padded to full lane width (zero padding, exact)

VMEM_SPEC = pl.BlockSpec(memory_space=pltpu.MemorySpace.VMEM)
SMEM_SPEC = pl.BlockSpec(memory_space=pltpu.MemorySpace.SMEM)


# ---------------------------------------------------------------------------
# In-kernel helpers.  All operate on (H, W) float32 *values*; border handling
# uses precomputed multiplicative 0/1 masks (no in-loop iota construction).
# masks = (not_col0, not_colW1, not_row0, not_rowH1)
# ---------------------------------------------------------------------------
def _blur3x3(p, masks):
    """Fixed symmetric Gaussian blur (1,2,1)x(1,2,1)/16, zero padded, separable."""
    mnc0, mncW, mnr0, mnrH = masks
    H, W = p.shape
    h = 0.25 * (pltpu.roll(p, shift=1, axis=1) * mnc0
                + 2.0 * p
                + pltpu.roll(p, shift=W - 1, axis=1) * mncW)
    return 0.25 * (pltpu.roll(h, shift=1, axis=0) * mnr0
                   + 2.0 * h
                   + pltpu.roll(h, shift=H - 1, axis=0) * mnrH)


def _tv_grad(x, masks):
    """Analytic grad of ALPHA * sum(huber(sqrt(dx^2+dy^2+1e-8))), with
    torch.diff(prepend=first row/col) semantics (exact autograd replacement)."""
    mnc0, mncW, mnr0, mnrH = masks
    H, W = x.shape
    dx = (x - pltpu.roll(x, shift=1, axis=1)) * mnc0
    dy = (x - pltpu.roll(x, shift=1, axis=0)) * mnr0
    s = jnp.sqrt(dx * dx + dy * dy + 1e-8)
    wgt = jnp.where(s <= HUBER_EPS, 1.0 / HUBER_EPS, 1.0 / s)
    gx = wgt * dx
    gy = wgt * dy
    gx_next = pltpu.roll(gx, shift=W - 1, axis=1) * mncW
    gy_next = pltpu.roll(gy, shift=H - 1, axis=0) * mnrH
    return ALPHA * (gx + gy - gx_next - gy_next)


def _conv3x3_relu(planes, w_ref, b_ref, cout, cin, masks):
    """3x3 'same' conv (PyTorch cross-correlation) + ReLU on a list of (H,W)
    planes.  Weights are OIHW flattened in SMEM; each shifted input plane is
    built once and reused for every output channel."""
    mnc0, mncW, mnr0, mnrH = masks
    H, W = planes[0].shape
    acc = [jnp.full((H, W), b_ref[co], dtype=jnp.float32) for co in range(cout)]
    for ci in range(cin):
        p = planes[ci]
        cols = {
            -1: pltpu.roll(p, shift=1, axis=1) * mnc0,      # value at x-1
            0: p,
            1: pltpu.roll(p, shift=W - 1, axis=1) * mncW,   # value at x+1
        }
        for ky, dy in enumerate((-1, 0, 1)):
            for kx, dx in enumerate((-1, 0, 1)):
                c = cols[dx]
                if dy == -1:
                    sp = pltpu.roll(c, shift=1, axis=0) * mnr0
                elif dy == 1:
                    sp = pltpu.roll(c, shift=H - 1, axis=0) * mnrH
                else:
                    sp = c
                for co in range(cout):
                    wv = w_ref[(co * cin + ci) * 9 + ky * 3 + kx]
                    acc[co] = acc[co] + wv * sp
    return [jnp.maximum(a, 0.0) for a in acc]


def _maxpool2x2(p, sel_c, sel_r):
    """2x2 / stride-2 max pool: pairwise roll+max, then one hoisted 0/1
    even-selector matmul per axis.  Requires even H and W."""
    H, W = p.shape
    m = jnp.maximum(p, pltpu.roll(p, shift=W - 1, axis=1))          # max(p[:,j], p[:,j+1])
    cm = jnp.dot(m, sel_c, preferred_element_type=jnp.float32)       # keep even cols
    mr = jnp.maximum(cm, pltpu.roll(cm, shift=H - 1, axis=0))
    return jnp.dot(sel_r, mr, preferred_element_type=jnp.float32)    # keep even rows


def _flatten_row_major(p2, tmat, fsel):
    """(R,C) -> (1, R*C) row-major (PyTorch .flatten()) using MXU + hoisted 0/1
    matrices only (no in-kernel reshape/relayout)."""
    R = p2.shape[0]
    tiled = jnp.dot(p2, tmat, preferred_element_type=jnp.float32)    # tiled[r,k] = p2[r, k%C]
    picked = tiled * fsel                                            # keep k where k//C == r
    ones_row = jnp.full((1, R), 1.0, dtype=jnp.float32)
    return jnp.dot(ones_row, picked, preferred_element_type=jnp.float32)   # (1, R*C)


# ---------------------------------------------------------------------------
# The fused per-iteration kernel.  Grid axis 0 = gradient-descent iteration.
# Carried state lives in VMEM scratch (persists across grid steps).
# ---------------------------------------------------------------------------
def _tau_iteration_kernel(x0_ref, by_ref, m1_ref, m2_ref,
                          sc1_ref, sr1_ref, sc2_ref, sr2_ref,
                          tmat_ref, fsel_ref,
                          c1w_ref, c1b_ref, c2w_ref, c2b_ref,
                          w1t_ref, b1_ref, w2t_ref, b2_ref,
                          xout_ref, tau_ref,
                          x_sc, aold_sc, gold_sc, tau_sc):
    it = pl.program_id(0)

    @pl.when(it == 0)
    def _():
        x_sc[...] = x0_ref[...]
        tau_sc[...] = jnp.zeros_like(tau_sc)

    masks1 = (m1_ref[0], m1_ref[1], m1_ref[2], m1_ref[3])
    masks2 = (m2_ref[0], m2_ref[1], m2_ref[2], m2_ref[3])

    x = x_sc[...]

    # adjoint_eval = A^T (A x - y), A = self-adjoint symmetric Gaussian blur.
    # blur(y) is iteration-invariant (linearity) and precomputed.
    a = _blur3x3(_blur3x3(x, masks1), masks1) - by_ref[...]
    # grad of the Huber-TV regularizer (exact, replaces torch.autograd.grad).
    g = _tv_grad(x, masks1)

    @pl.when(it == 0)
    def _():
        aold_sc[...] = a     # at i == 0 the "old" quantities equal the new ones
        gold_sc[...] = g

    a_old = aold_sc[...]
    g_old = gold_sc[...]

    # u = cat([x, adjoint_eval, x_old, adjoint_eval_old, grad_reg_new, grad_reg_old]);
    # x_old == x when u is built, so the duplicated x channel is merged into the
    # first conv1 channel by pre-summing its weights on the host (5 eff. channels).
    u_planes = [x, a, a_old, g, g_old]

    c1 = _conv3x3_relu(u_planes, c1w_ref, c1b_ref, cout=3, cin=5, masks=masks1)
    sc1 = sc1_ref[...]
    sr1 = sr1_ref[...]
    p1 = [_maxpool2x2(c, sc1, sr1) for c in c1]                      # 3 x (H/2, W/2)
    c2 = _conv3x3_relu(p1, c2w_ref, c2b_ref, cout=1, cin=3, masks=masks2)
    p2 = _maxpool2x2(c2[0], sc2_ref[...], sr2_ref[...])              # (H/4, W/4)

    u_flat = _flatten_row_major(p2, tmat_ref[...], fsel_ref[...])    # (1, H/4*W/4)
    h = jnp.maximum(
        jnp.dot(u_flat, w1t_ref[...], preferred_element_type=jnp.float32) + b1_ref[...],
        0.0)                                                         # (1, FC_PAD)
    t = jnp.dot(h, w2t_ref[...], preferred_element_type=jnp.float32) + b2_ref[...]  # (1, 1)
    # softplus (beta=1, threshold=20) as in torch.nn.functional.softplus
    tau = jnp.where(t > 20.0, t, jnp.log1p(jnp.exp(jnp.minimum(t, 20.0))))

    x_new = x - jnp.broadcast_to(tau, x.shape) * (a + g)

    # carry state to the next grid step
    x_sc[...] = x_new
    aold_sc[...] = a
    gold_sc[...] = g

    # per-iteration outputs: x (one (1,H,W) block per step) and tau, accumulated
    # in a lane-dense VMEM row and DMA'd to HBM once after the last step.
    xout_ref[0] = x_new
    lane = lax.broadcasted_iota(jnp.int32, tau_sc.shape, 1)
    tau_sc[...] = jnp.where(lane == it, jnp.broadcast_to(tau, tau_sc.shape), tau_sc[...])
    tau_ref[...] = tau_sc[...]


def _build_forward(H, W, n_iter):
    assert H % 4 == 0 and W % 4 == 0, "two 2x2 max-pools require H, W % 4 == 0"
    H2, W2 = H // 2, W // 2
    H4, W4 = H // 4, W // 4
    fc_in = H4 * W4
    tau_pad = max(128, ((n_iter + 127) // 128) * 128)

    grid_spec = pltpu.PrefetchScalarGridSpec(
        num_scalar_prefetch=0,
        grid=(n_iter,),
        in_specs=[
            pl.BlockSpec((H, W), lambda i: (0, 0)),           # x0 (loaded once)
            pl.BlockSpec((H, W), lambda i: (0, 0)),           # blur(y) (loaded once)
            pl.BlockSpec((4, H, W), lambda i: (0, 0, 0)),     # border masks @ (H, W)
            pl.BlockSpec((4, H2, W2), lambda i: (0, 0, 0)),   # border masks @ (H/2, W/2)
            pl.BlockSpec((W, W2), lambda i: (0, 0)),          # pool1 column selector
            pl.BlockSpec((H2, H), lambda i: (0, 0)),          # pool1 row selector
            pl.BlockSpec((W2, W4), lambda i: (0, 0)),         # pool2 column selector
            pl.BlockSpec((H4, H2), lambda i: (0, 0)),         # pool2 row selector
            pl.BlockSpec((W4, fc_in), lambda i: (0, 0)),      # flatten tiling matrix
            pl.BlockSpec((H4, fc_in), lambda i: (0, 0)),      # flatten row selector
            SMEM_SPEC,                                        # conv1 weight (merged, 135)
            SMEM_SPEC,                                        # conv1 bias (3,)
            SMEM_SPEC,                                        # conv2 weight (27,)
            SMEM_SPEC,                                        # conv2 bias (1,)
            pl.BlockSpec((fc_in, FC_PAD), lambda i: (0, 0)),  # fc1 weight (in, out-pad)
            pl.BlockSpec((1, FC_PAD), lambda i: (0, 0)),      # fc1 bias
            pl.BlockSpec((FC_PAD, 1), lambda i: (0, 0)),      # fc2 weight
            pl.BlockSpec((1, 1), lambda i: (0, 0)),           # fc2 bias
        ],
        out_specs=[
            pl.BlockSpec((1, H, W), lambda i: (i, 0, 0)),     # x after each iteration
            pl.BlockSpec((1, tau_pad), lambda i: (0, 0)),     # per-iteration tau (resident)
        ],
        scratch_shapes=[
            pltpu.VMEM((H, W), jnp.float32),        # x (carried)
            pltpu.VMEM((H, W), jnp.float32),        # adjoint_eval_old
            pltpu.VMEM((H, W), jnp.float32),        # grad_reg_old
            pltpu.VMEM((1, tau_pad), jnp.float32),  # tau accumulator
        ],
    )
    return pl.pallas_call(
        _tau_iteration_kernel,
        out_shape=(jax.ShapeDtypeStruct((n_iter, H, W), jnp.float32),
                   jax.ShapeDtypeStruct((1, tau_pad), jnp.float32)),
        grid_spec=grid_spec,
        compiler_params=pltpu.CompilerParams(
            dimension_semantics=("arbitrary",),               # sequential GD iterations
            # ~6 MiB resident constants (x2 buffers) + ~4 MiB live intermediates;
            # 32 MiB (down from 48) leaves headroom on v7x's 64 MiB physical VMEM.
            vmem_limit_bytes=32 * 1024 * 1024,
        ),
    )


# ---------------------------------------------------------------------------
# Standalone blur kernel: the forward operator A (used to synthesize y and to
# precompute the iteration-invariant blur(y)).
# ---------------------------------------------------------------------------
def _blur_kernel(x_ref, o_ref):
    H, W = x_ref.shape
    row = lax.broadcasted_iota(jnp.int32, (H, W), 0)
    col = lax.broadcasted_iota(jnp.int32, (H, W), 1)
    masks = ((col != 0).astype(jnp.float32),
             (col != W - 1).astype(jnp.float32),
             (row != 0).astype(jnp.float32),
             (row != H - 1).astype(jnp.float32))
    o_ref[...] = _blur3x3(x_ref[...], masks)


def _build_blur(H, W):
    return pl.pallas_call(
        _blur_kernel,
        out_shape=jax.ShapeDtypeStruct((H, W), jnp.float32),
        in_specs=[VMEM_SPEC],
        out_specs=VMEM_SPEC,
    )


def blur_op_2d(img_hw):
    img_hw = jnp.asarray(img_hw, jnp.float32)
    return _build_blur(*img_hw.shape)(img_hw)


# ---------------------------------------------------------------------------
# Host-side iteration-invariant constants (hoisted out of the grid loop).
# ---------------------------------------------------------------------------
def _aux_constants(H, W):
    def border_masks(h, w):
        col = jnp.arange(w)[None, :]
        row = jnp.arange(h)[:, None]
        return jnp.stack([
            jnp.broadcast_to(col != 0, (h, w)),
            jnp.broadcast_to(col != w - 1, (h, w)),
            jnp.broadcast_to(row != 0, (h, w)),
            jnp.broadcast_to(row != h - 1, (h, w)),
        ]).astype(jnp.float32)

    def pool_col_selector(n):                # (n, n//2): picks even indices
        i = jnp.arange(n)[:, None]
        j = jnp.arange(n // 2)[None, :]
        return (i == 2 * j).astype(jnp.float32)

    H4, W4 = H // 4, W // 4
    k = jnp.arange(H4 * W4)[None, :]
    tmat = (k % W4 == jnp.arange(W4)[:, None]).astype(jnp.float32)   # (W4, K)
    fsel = (k // W4 == jnp.arange(H4)[:, None]).astype(jnp.float32)  # (H4, K)
    return dict(
        m1=border_masks(H, W),
        m2=border_masks(H // 2, W // 2),
        sc1=pool_col_selector(W),
        sr1=pool_col_selector(H).T,
        sc2=pool_col_selector(W // 2),
        sr2=pool_col_selector(H // 2).T,
        tmat=tmat,
        fsel=fsel,
    )


@functools.partial(jax.jit, static_argnames=("n_iter",))
def _tau_model_device(params, x0_hw, y_hw, n_iter):
    H, W = x0_hw.shape
    fc_in = (H // 4) * (W // 4)

    # iteration-invariant data (hoisted): blur(y) + masks/selectors/flatten mats
    by = _build_blur(H, W)(y_hw.astype(jnp.float32))
    aux = _aux_constants(H, W)

    # conv1: merge the duplicated x channel (u channels 0 and 2) -> 5 eff. channels
    c1w = jnp.asarray(params["c1w"], jnp.float32)                    # (3, 6, 3, 3)
    c1w_eff = jnp.concatenate(
        [c1w[:, 0:1] + c1w[:, 2:3],      # merged x channel
         c1w[:, 1:2],                    # adjoint_eval
         c1w[:, 3:4],                    # adjoint_eval_old
         c1w[:, 4:5],                    # grad_reg_new
         c1w[:, 5:6]],                   # grad_reg_old
        axis=1)                                                      # (3, 5, 3, 3)

    # fc head padded to full lane width (exact: zero padding)
    w1t = jnp.asarray(params["w1t"], jnp.float32)                    # (fc_in, 64)
    assert w1t.shape[0] == fc_in
    fc_out = w1t.shape[1]
    assert fc_out <= FC_PAD
    w1t_p = jnp.zeros((fc_in, FC_PAD), jnp.float32).at[:, :fc_out].set(w1t)
    b1_p = jnp.zeros((1, FC_PAD), jnp.float32).at[0, :fc_out].set(
        jnp.asarray(params["b1"], jnp.float32))
    w2t_p = jnp.zeros((FC_PAD, 1), jnp.float32).at[:fc_out].set(
        jnp.asarray(params["w2t"], jnp.float32))
    b2 = jnp.asarray(params["b2"], jnp.float32).reshape(1, 1)

    call = _build_forward(H, W, n_iter)
    return call(
        x0_hw.astype(jnp.float32),
        by,
        aux["m1"], aux["m2"],
        aux["sc1"], aux["sr1"], aux["sc2"], aux["sr2"],
        aux["tmat"], aux["fsel"],
        c1w_eff.reshape(-1),
        jnp.asarray(params["c1b"], jnp.float32),
        jnp.asarray(params["c2w"], jnp.float32).reshape(-1),
        jnp.asarray(params["c2b"], jnp.float32),
        w1t_p, b1_p, w2t_p, b2,
    )


def tau_model_forward(params, x, y, n_iter=1):
    """Mirrors TauModel.forward.  x, y: (1,1,H,W).  Returns (x, tau_list, x_list)."""
    x_all, tau_row = _tau_model_device(params, x[0, 0], y[0, 0], n_iter)
    x_final = x_all[n_iter - 1][None, None]
    # Single host transfer AFTER the whole device computation (no per-iter syncs).
    x_np = np.asarray(x_all)
    tau_np = np.asarray(tau_row)[0, :n_iter]
    x_list = [x_np[i][None, None] for i in range(n_iter)]
    tau_list = [float(tau_np[i]) for i in range(n_iter)]
    return x_final, tau_list, x_list


# ---------------------------------------------------------------------------
# Parameter init (PyTorch default uniform(-1/sqrt(fan_in), 1/sqrt(fan_in))).
# ---------------------------------------------------------------------------
def init_params(key):
    ks = jax.random.split(key, 8)

    def u(k, shape, fan_in):
        bound = 1.0 / np.sqrt(fan_in)
        return jax.random.uniform(k, shape, jnp.float32, -bound, bound)

    return {
        "c1w": u(ks[0], (3, 6, 3, 3), 6 * 9),
        "c1b": u(ks[1], (3,), 6 * 9),
        "c2w": u(ks[2], (1, 3, 3, 3), 3 * 9),
        "c2b": u(ks[3], (1,), 3 * 9),
        "w1t": u(ks[4], (64 * 64, 64), 64 * 64),   # fc1 weight, stored (in, out)
        "b1":  u(ks[5], (64,), 64 * 64),
        "w2t": u(ks[6], (64, 1), 64),              # fc2 weight, stored (in, out)
        "b2":  u(ks[7], (1,), 64),
    }


if __name__ == "__main__":
    # fc1 = Linear(64*64, 64) after two 2x2 pools forces a 256x256 input image.
    H = W = 256
    key = jax.random.PRNGKey(0)
    kp, kx = jax.random.split(key)
    params = init_params(kp)

    x_gt = jax.random.normal(kx, (1, 1, H, W), jnp.float32)
    y = blur_op_2d(x_gt[0, 0])[None, None]   # measured (blurred) data
    x0 = y                                    # initial reconstruction

    x_final, tau_list, x_list = tau_model_forward(params, x0, y, n_iter=2)
    jax.block_until_ready(x_final)

    assert x_final.shape == (1, 1, H, W)
    assert len(tau_list) == 2 and len(x_list) == 2
    assert np.all(np.isfinite(np.asarray(x_final)))
    assert all(np.isfinite(t) for t in tau_list)
    print("KERNEL_OK")
</pallas_src>

<mosaic_0001>
module attributes {stable_mosaic.version = 11 : i64} {
  func.func @_blur_kernel(%arg0: memref<256x256xf32, #tpu.memory_space<vmem>>, %arg1: memref<256x256xf32, #tpu.memory_space<vmem>>) attributes {dimension_semantics = [], scalar_prefetch = 0 : i64, scratch_operands = 0 : i64, tpu.core_type = #tpu.core_type<tc>} {
    %0 = tpu.iota {dimensions = array<i32: 0>} : vector<256x256xi32>
    %1 = tpu.iota {dimensions = array<i32: 1>} : vector<256x256xi32>
    %c0_i32 = arith.constant 0 : i32
    %2 = vector.broadcast %c0_i32 : i32 to vector<256x256xi32>
    %3 = arith.cmpi ne, %1, %2 : vector<256x256xi32>
    %4 = arith.extui %3 : vector<256x256xi1> to vector<256x256xi32>
    %5 = arith.sitofp %4 : vector<256x256xi32> to vector<256x256xf32>
    %c255_i32 = arith.constant 255 : i32
    %6 = vector.broadcast %c255_i32 : i32 to vector<256x256xi32>
    %7 = arith.cmpi ne, %1, %6 : vector<256x256xi32>
    %8 = arith.extui %7 : vector<256x256xi1> to vector<256x256xi32>
    %9 = arith.sitofp %8 : vector<256x256xi32> to vector<256x256xf32>
    %c0_i32_0 = arith.constant 0 : i32
    %10 = vector.broadcast %c0_i32_0 : i32 to vector<256x256xi32>
    %11 = arith.cmpi ne, %0, %10 : vector<256x256xi32>
    %12 = arith.extui %11 : vector<256x256xi1> to vector<256x256xi32>
    %13 = arith.sitofp %12 : vector<256x256xi32> to vector<256x256xf32>
    %c255_i32_1 = arith.constant 255 : i32
    %14 = vector.broadcast %c255_i32_1 : i32 to vector<256x256xi32>
    %15 = arith.cmpi ne, %0, %14 : vector<256x256xi32>
    %16 = arith.extui %15 : vector<256x256xi1> to vector<256x256xi32>
    %17 = arith.sitofp %16 : vector<256x256xi32> to vector<256x256xf32>
    %c0 = arith.constant 0 : index
    %c0_2 = arith.constant 0 : index
    %18 = vector.load %arg0[%c0, %c0_2] : memref<256x256xf32, #tpu.memory_space<vmem>>, vector<256x256xf32>
    %c1_i32 = arith.constant 1 : i32
    %19 = tpu.dynamic_rotate %18 by %c1_i32 dim 1 : vector<256x256xf32>, i32 -> vector<256x256xf32>
    %20 = arith.mulf %19, %5 : vector<256x256xf32>
    %cst = arith.constant 2.000000e+00 : f32
    %21 = vector.broadcast %cst : f32 to vector<256x256xf32>
    %22 = arith.mulf %21, %18 : vector<256x256xf32>
    %23 = arith.addf %20, %22 : vector<256x256xf32>
    %c255_i32_3 = arith.constant 255 : i32
    %24 = tpu.dynamic_rotate %18 by %c255_i32_3 dim 1 : vector<256x256xf32>, i32 -> vector<256x256xf32>
    %25 = arith.mulf %24, %9 : vector<256x256xf32>
    %26 = arith.addf %23, %25 : vector<256x256xf32>
    %cst_4 = arith.constant 2.500000e-01 : f32
    %27 = vector.broadcast %cst_4 : f32 to vector<256x256xf32>
    %28 = arith.mulf %27, %26 : vector<256x256xf32>
    %c1_i32_5 = arith.constant 1 : i32
    %29 = tpu.dynamic_rotate %28 by %c1_i32_5 dim 0 : vector<256x256xf32>, i32 -> vector<256x256xf32>
    %30 = arith.mulf %29, %13 : vector<256x256xf32>
    %cst_6 = arith.constant 2.000000e+00 : f32
    %31 = vector.broadcast %cst_6 : f32 to vector<256x256xf32>
    %32 = arith.mulf %31, %28 : vector<256x256xf32>
    %33 = arith.addf %30, %32 : vector<256x256xf32>
    %c255_i32_7 = arith.constant 255 : i32
    %34 = tpu.dynamic_rotate %28 by %c255_i32_7 dim 0 : vector<256x256xf32>, i32 -> vector<256x256xf32>
    %35 = arith.mulf %34, %17 : vector<256x256xf32>
    %36 = arith.addf %33, %35 : vector<256x256xf32>
    %cst_8 = arith.constant 2.500000e-01 : f32
    %37 = vector.broadcast %cst_8 : f32 to vector<256x256xf32>
    %38 = arith.mulf %37, %36 : vector<256x256xf32>
    %c0_9 = arith.constant 0 : index
    %c0_10 = arith.constant 0 : index
    %39 = vector.load %arg1[%c0_9, %c0_10] : memref<256x256xf32, #tpu.memory_space<vmem>>, vector<256x256xf32>
    tpu.vector_store %arg1[%c0_9, %c0_10], %38 {strides = array<i32>} : memref<256x256xf32, #tpu.memory_space<vmem>>, vector<256x256xf32>,
    return
  }
}

</mosaic_0001>

<bundles_post_ra>
// kernel: tpu_custom_call.1
= control target key start
LH: loop header
LB: loop body
LE: loop exit
PB: predicated region body
PF: predicated region fallthrough
CT: control target
= control target key end

     0   :  { %6 = vsyncpa [#allocation3], 0  ;;  %s4207_s0 = inlined_call_operand.hbm [shape: f32[256,256], index: 0, kind: input, shape index: {}]   ;;  %s4208_s1 = inlined_call_operand.hbm [shape: f32[256,256], index: 1, kind: output, shape index: {}]  }
   0x1   :  { %7 = vsyncpa [#allocation4], 0  ;;  %s12_s8 = sshll.u32 %s4207_s0, 4  ;;  %s1887_s9 = smov [#allocation2]   ;;  %s13_s8 = int_to_ptr.hbm [resolvable:$true] %s12_s8 }
   0x2   :  { %s14_s10 = sshll.u32 %s1887_s9, 4  ;;  %s1888_s11 = smov 256   ;;  %s15_s10 = int_to_ptr.vmem [resolvable:$true] %s14_s10 }
   0x3   :  { %s1889_s12 = smov 16  }
   0x4   :  { %20 = dma.hbm_to_vmem [thread:$0]  %s13_s8, 8192, %s15_s10, [#allocation3], %s1888_s11, %s1888_s11, %s1889_s12  }
   0x5   :  { %1883 = dma.done.wait [#allocation3], 8192  }
   0x6   :  { %1884 = vsyncadd [#allocation3], 4294959104  ;;  %v1910_v0 = vld [vmem:[#allocation2 + $0x40] sm:$0xff]  ;;  %s1890_s13 = smov 1   ;;  %v1922_v3 = vld [vmem:[#allocation2 + $0x50] sm:$0xff]  ;;  %s1891_s0 = smov 127  }
   0x7   :  { %v1912_v1 = vld [vmem:[#allocation2 + $0x20] sm:$0xff]  ;;  %337 = vrot.lane.b32.xlu2 %v1910_v0, %s1890_s13  ;;  %v1924_v4 = vld [vmem:[#allocation2 + $0x30] sm:$0xff]  ;;  %v2032_v31 = vld [vmem:[#allocation2 + $0x8] sm:$0xff]  ;;  %s1893_s14 = smov [#allocation5]   ;;  %s1811_s18 = sshll.u32 %s4208_s1, 4  ;;  %s1812_s18 = int_to_ptr.hbm [resolvable:$true] %s1811_s18 }
   0x8   :  { %v1914_v2 = vld [vmem:[#allocation2] sm:$0xff]  ;;  %333 = vrot.lane.b32.xlu1 %v1912_v1, %s1890_s13  ;;  %v1926_v5 = vld [vmem:[#allocation2 + $0x10] sm:$0xff]  ;;  %v2042_v33 = vld [vmem:[#allocation2 + $0x28] sm:$0xff]  ;;  %s1809_s15 = sshll.u32 %s1893_s14, 4  ;;  %s1810_s15 = int_to_ptr.vmem [resolvable:$true] %s1809_s15 }
   0x9   :  { %329 = vrot.lane.b32.xlu0 %v1914_v2, %s1890_s13  ;;  %v1934_v6 = vld [vmem:[#allocation2 + $0x80] sm:$0xff]  ;;  %v1936_v7 = vld [vmem:[#allocation2 + $0x70] sm:$0xff]  ;;  %v2044_v34 = vld [vmem:[#allocation2 + $0x38] sm:$0xff] }
   0xa   :  { %v1938_v8 = vld [vmem:[#allocation2 + $0x60] sm:$0xff]  ;;  %v1946_v9 = vld [vmem:[#allocation2 + $0xb0] sm:$0xff]  ;;  %v2046_v35 = vld [vmem:[#allocation2 + $0x18] sm:$0xff] }
   0xb   :  { %v1948_v10 = vld [vmem:[#allocation2 + $0xa0] sm:$0xff]  ;;  %v1950_v11 = vld [vmem:[#allocation2 + $0x90] sm:$0xff]  ;;  %v2056_v37 = vld [vmem:[#allocation2 + $0x58] sm:$0xff] }
   0xc   :  { %v1958_v12 = vld [vmem:[#allocation2 + $0xe0] sm:$0xff]  ;;  %v1960_v13 = vld [vmem:[#allocation2 + $0xd0] sm:$0xff]  ;;  %v2058_v38 = vld [vmem:[#allocation2 + $0x68] sm:$0xff] }
   0xd   :  { %v1962_v14 = vld [vmem:[#allocation2 + $0xc0] sm:$0xff]  ;;  %v1970_v15 = vld [vmem:[#allocation2 + $0x110] sm:$0xff]  ;;  %v2060_v39 = vld [vmem:[#allocation2 + $0x48] sm:$0xff] }
   0xe   :  { %v1972_v16 = vld [vmem:[#allocation2 + $0x100] sm:$0xff]  ;;  %v1974_v17 = vld [vmem:[#allocation2 + $0xf0] sm:$0xff]  ;;  %v2070_v41 = vld [vmem:[#allocation2 + $0x88] sm:$0xff] }
   0xf   :  { %339 = vrot.lane.b32.xlu2 %v1922_v3, %s1890_s13  ;;  %v1982_v18 = vld [vmem:[#allocation2 + $0x140] sm:$0xff]  ;;  %v1984_v19 = vld [vmem:[#allocation2 + $0x130] sm:$0xff]  ;;  %v2072_v42 = vld [vmem:[#allocation2 + $0x98] sm:$0xff] }
  0x10   :  { %335 = vrot.lane.b32.xlu1 %v1924_v4, %s1890_s13  ;;  %v1986_v20 = vld [vmem:[#allocation2 + $0x120] sm:$0xff]  ;;  %v1994_v21 = vld [vmem:[#allocation2 + $0x170] sm:$0xff]  ;;  %v2074_v43 = vld [vmem:[#allocation2 + $0x78] sm:$0xff] }
  0x11   :  { %331 = vrot.lane.b32.xlu0 %v1926_v5, %s1890_s13  ;;  %v1996_v22 = vld [vmem:[#allocation2 + $0x160] sm:$0xff]  ;;  %v1998_v23 = vld [vmem:[#allocation2 + $0x150] sm:$0xff]  ;;  %v2084_v45 = vld [vmem:[#allocation2 + $0xb8] sm:$0xff] }
  0x12   :  { %v2006_v24 = vld [vmem:[#allocation2 + $0x1a0] sm:$0xff]  ;;  %v2008_v25 = vld [vmem:[#allocation2 + $0x190] sm:$0xff]  ;;  %v2086_v46 = vld [vmem:[#allocation2 + $0xc8] sm:$0xff] }
  0x13   :  { %v2010_v26 = vld [vmem:[#allocation2 + $0x180] sm:$0xff]  ;;  %v2018_v27 = vld [vmem:[#allocation2 + $0x1d0] sm:$0xff]  ;;  %v2088_v47 = vld [vmem:[#allocation2 + $0xa8] sm:$0xff] }
  0x14   :  { %v2020_v28 = vld [vmem:[#allocation2 + $0x1c0] sm:$0xff]  ;;  %v2022_v29 = vld [vmem:[#allocation2 + $0x1b0] sm:$0xff]  ;;  %v2102_v51 = vld [vmem:[#allocation2 + $0xe8] sm:$0xff] }
  0x15   :  { %v2030_v30 = vld [vmem:[#allocation2 + $0x1f0] sm:$0xff]  ;;  %v2034_v32 = vld [vmem:[#allocation2 + $0x1e0] sm:$0xff]  ;;  %v2104_v52 = vld [vmem:[#allocation2 + $0xf8] sm:$0xff] }
  0x16   :  { %v2106_v53 = vld [vmem:[#allocation2 + $0xd8] sm:$0xff]  ;;  %v2122_v58 = vld [vmem:[#allocation2 + $0x128] sm:$0xff] }
  0x17   :  { %345 = vrot.lane.b32.xlu2 %v1934_v6, %s1890_s13  ;;  %v2120_v57 = vld [vmem:[#allocation2 + $0x118] sm:$0xff]  ;;  %4325 = vst [vmem:[#allocation16_spill] sm:$0xff] %v2122_v58  ;;  %v2124_v59 = vld [vmem:[#allocation2 + $0x108] sm:$0xff] }
  0x18   :  { %343 = vrot.lane.b32.xlu1 %v1936_v7, %s1890_s13  ;;  %4324 = vst [vmem:[#allocation15_spill] sm:$0xff] %v2120_v57  ;;  %v2138_v63 = vld [vmem:[#allocation2 + $0x148] sm:$0xff] }
  0x19   :  { %341 = vrot.lane.b32.xlu0 %v1938_v8, %s1890_s13  ;;  %4328 = vst [vmem:[#allocation19_spill] sm:$0xff] %v2138_v63 }
  0x1f   :  { %351 = vrot.lane.b32.xlu2 %v1946_v9, %s1890_s13 }
  0x20   :  { %349 = vrot.lane.b32.xlu1 %v1948_v10, %s1890_s13 }
  0x21   :  { %347 = vrot.lane.b32.xlu0 %v1950_v11, %s1890_s13 }
  0x27   :  { %357 = vrot.lane.b32.xlu2 %v1958_v12, %s1890_s13 }
  0x28   :  { %355 = vrot.lane.b32.xlu1 %v1960_v13, %s1890_s13 }
  0x29   :  { %353 = vrot.lane.b32.xlu0 %v1962_v14, %s1890_s13 }
  0x2f   :  { %363 = vrot.lane.b32.xlu2 %v1970_v15, %s1890_s13 }
  0x30   :  { %361 = vrot.lane.b32.xlu1 %v1972_v16, %s1890_s13 }
  0x31   :  { %359 = vrot.lane.b32.xlu0 %v1974_v17, %s1890_s13 }
  0x37   :  { %369 = vrot.lane.b32.xlu2 %v1982_v18, %s1890_s13 }
  0x38   :  { %367 = vrot.lane.b32.xlu1 %v1984_v19, %s1890_s13 }
  0x39   :  { %365 = vrot.lane.b32.xlu0 %v1986_v20, %s1890_s13 }
  0x3f   :  { %375 = vrot.lane.b32.xlu2 %v1994_v21, %s1890_s13 }
  0x40   :  { %373 = vrot.lane.b32.xlu1 %v1996_v22, %s1890_s13 }
  0x41   :  { %371 = vrot.lane.b32.xlu0 %v1998_v23, %s1890_s13 }
  0x47   :  { %381 = vrot.lane.b32.xlu2 %v2006_v24, %s1890_s13 }
  0x48   :  { %379 = vrot.lane.b32.xlu1 %v2008_v25, %s1890_s13 }
  0x49   :  { %377 = vrot.lane.b32.xlu0 %v2010_v26, %s1890_s13 }
  0x4f   :  { %387 = vrot.lane.b32.xlu2 %v2018_v27, %s1890_s13 }
  0x50   :  { %385 = vrot.lane.b32.xlu1 %v2020_v28, %s1890_s13 }
  0x51   :  { %383 = vrot.lane.b32.xlu0 %v2022_v29, %s1890_s13 }
  0x57   :  { %393 = vrot.lane.b32.xlu2 %v2032_v31, %s1890_s13 }
  0x58   :  { %391 = vrot.lane.b32.xlu1 %v2030_v30, %s1890_s13 }
  0x59   :  { %389 = vrot.lane.b32.xlu0 %v2034_v32, %s1890_s13 }
  0x5f   :  { %399 = vrot.lane.b32.xlu2 %v2044_v34, %s1890_s13 }
  0x60   :  { %397 = vrot.lane.b32.xlu1 %v2042_v33, %s1890_s13 }
  0x61   :  { %395 = vrot.lane.b32.xlu0 %v2046_v35, %s1890_s13  ;;  %v2054_v36 = vpop.permute.xlu2 %337 }
  0x62   :  { %4317 = vst [vmem:[#allocation8_spill] sm:$0xff] %v2054_v36  ;;  %v2156_v36 = vld [vmem:[#allocation2 + $0x178] sm:$0xff] }
  0x63   :  { %4333 = vst [vmem:[#allocation24_spill] sm:$0xff] %v2156_v36 }
  0x67   :  { %405 = vrot.lane.b32.xlu2 %v2058_v38, %s1890_s13 }
  0x68   :  { %403 = vrot.lane.b32.xlu1 %v2056_v37, %s1890_s13 }
  0x69   :  { %401 = vrot.lane.b32.xlu0 %v2060_v39, %s1890_s13  ;;  %v2068_v40 = vpop.permute.xlu2 %339 }
  0x6a   :  { %4318 = vst [vmem:[#allocation9_spill] sm:$0xff] %v2068_v40  ;;  %v2158_v40 = vld [vmem:[#allocation2 + $0x188] sm:$0xff] }
  0x6b   :  { %4334 = vst [vmem:[#allocation25_spill] sm:$0xff] %v2158_v40 }
  0x6f   :  { %411 = vrot.lane.b32.xlu2 %v2072_v42, %s1890_s13 }
  0x70   :  { %409 = vrot.lane.b32.xlu1 %v2070_v41, %s1890_s13 }
  0x71   :  { %407 = vrot.lane.b32.xlu0 %v2074_v43, %s1890_s13  ;;  %v2082_v44 = vpop.permute.xlu2 %345 }
  0x72   :  { %4319 = vst [vmem:[#allocation10_spill] sm:$0xff] %v2082_v44 }
  0x77   :  { %417 = vrot.lane.b32.xlu2 %v2086_v46, %s1890_s13 }
  0x78   :  { %415 = vrot.lane.b32.xlu1 %v2084_v45, %s1890_s13 }
  0x79   :  { %413 = vrot.lane.b32.xlu0 %v2088_v47, %s1890_s13  ;;  %v2096_v48 = vpop.permute.xlu2 %351 }
  0x7a   :  { %4320 = vst [vmem:[#allocation11_spill] sm:$0xff] %v2096_v48  ;;  %v2098_v49 = vpop.permute.xlu1 %333  ;;  %v2142_v48 = vld [vmem:[#allocation2 + $0x138] sm:$0xff] }
  0x7b   :  { %4321 = vst [vmem:[#allocation12_spill] sm:$0xff] %v2098_v49  ;;  %v2100_v50 = vpop.permute.xlu0 %329 }
  0x7c   :  { %4330 = vst [vmem:[#allocation21_spill] sm:$0xff] %v2142_v48 }
  0x7f   :  { %423 = vrot.lane.b32.xlu2 %v2104_v52, %s1890_s13 }
  0x80   :  { %421 = vrot.lane.b32.xlu1 %v2102_v51, %s1890_s13 }
  0x81   :  { %419 = vrot.lane.b32.xlu0 %v2106_v53, %s1890_s13  ;;  %v2114_v54 = vpop.permute.xlu2 %357 }
  0x82   :  { %4322 = vst [vmem:[#allocation13_spill] sm:$0xff] %v2114_v54  ;;  %v2116_v55 = vpop.permute.xlu1 %335  ;;  %v2140_v54 = vld [vmem:[#allocation2 + $0x158] sm:$0xff] }
  0x83   :  { %v2118_v56 = vpop.permute.xlu0 %331  ;;  %4329 = vst [vmem:[#allocation20_spill] sm:$0xff] %v2140_v54 }
  0x84   :  { %4323 = vst [vmem:[#allocation14_spill] sm:$0xff] %v2118_v56  ;;  %v2160_v56 = vld [vmem:[#allocation2 + $0x168] sm:$0xff] }
  0x85   :  { %4335 = vst [vmem:[#allocation26_spill] sm:$0xff] %v2160_v56 }
  0x87   :  { %429 = vrot.lane.b32.xlu2 %v2122_v58, %s1890_s13  ;;  %v2194_v58 = vld [vmem:[#allocation2 + $0x1c8] sm:$0xff] }
  0x88   :  { %427 = vrot.lane.b32.xlu1 %v2120_v57, %s1890_s13  ;;  %v2178_v57 = vld [vmem:[#allocation2 + $0x198] sm:$0xff]  ;;  %4345 = vst [vmem:[#allocation36_spill] sm:$0xff] %v2194_v58 }
  0x89   :  { %425 = vrot.lane.b32.xlu0 %v2124_v59, %s1890_s13  ;;  %v2132_v60 = vpop.permute.xlu2 %363  ;;  %4340 = vst [vmem:[#allocation31_spill] sm:$0xff] %v2178_v57 }
  0x8a   :  { %4326 = vst [vmem:[#allocation17_spill] sm:$0xff] %v2132_v60  ;;  %v2134_v61 = vpop.permute.xlu1 %343 }
  0x8b   :  { %4327 = vst [vmem:[#allocation18_spill] sm:$0xff] %v2134_v61  ;;  %v2136_v62 = vpop.permute.xlu0 %341 }
  0x8f   :  { %435 = vrot.lane.b32.xlu2 %v2140_v54, %s1890_s13  ;;  %v2176_v54 = vld [vmem:[#allocation2 + $0x1b8] sm:$0xff] }
  0x90   :  { %433 = vrot.lane.b32.xlu1 %v2138_v63, %s1890_s13  ;;  %v2174_v63 = vld [vmem:[#allocation2 + $0x1a8] sm:$0xff]  ;;  %4339 = vst [vmem:[#allocation30_spill] sm:$0xff] %v2176_v54 }
  0x91   :  { %431 = vrot.lane.b32.xlu0 %v2142_v48, %s1890_s13  ;;  %v2150_v60 = vpop.permute.xlu2 %369  ;;  %4338 = vst [vmem:[#allocation29_spill] sm:$0xff] %v2174_v63  ;;  %v2209_v48 = vld [vmem:[#allocation2 + $0x1f8] sm:$0xff] }
  0x92   :  { %4331 = vst [vmem:[#allocation22_spill] sm:$0xff] %v2150_v60  ;;  %v2152_v61 = vpop.permute.xlu1 %349 }
  0x93   :  { %4332 = vst [vmem:[#allocation23_spill] sm:$0xff] %v2152_v61  ;;  %v2154_v44 = vpop.permute.xlu0 %347 }
  0x97   :  { %441 = vrot.lane.b32.xlu2 %v2158_v40, %s1890_s13  ;;  %v2190_v40 = vld [vmem:[#allocation2 + $0x1d8] sm:$0xff] }
  0x98   :  { %439 = vrot.lane.b32.xlu1 %v2156_v36, %s1890_s13  ;;  %4343 = vst [vmem:[#allocation34_spill] sm:$0xff] %v2190_v40 }
  0x99   :  { %437 = vrot.lane.b32.xlu0 %v2160_v56, %s1890_s13  ;;  %v2168_v60 = vpop.permute.xlu2 %375  ;;  %v2192_v56 = vld [vmem:[#allocation2 + $0x1e8] sm:$0xff] }
  0x9a   :  { %4336 = vst [vmem:[#allocation27_spill] sm:$0xff] %v2168_v60  ;;  %v2170_v61 = vpop.permute.xlu1 %355 }
  0x9b   :  { %4337 = vst [vmem:[#allocation28_spill] sm:$0xff] %v2170_v61  ;;  %v2172_v49 = vpop.permute.xlu0 %353 }
  0x9c   :  { %4344 = vst [vmem:[#allocation35_spill] sm:$0xff] %v2192_v56 }
  0x9f   :  { %447 = vrot.lane.b32.xlu2 %v2176_v54, %s1890_s13  ;;  %v4248_v54 = vlaneseq }
  0xa0   :  { %445 = vrot.lane.b32.xlu1 %v2174_v63, %s1890_s13 }
  0xa1   :  { %443 = vrot.lane.b32.xlu0 %v2178_v57, %s1890_s13  ;;  %v2186_v60 = vpop.permute.xlu2 %381  ;;  %v2207_v57 = vand.u32 127, %v4248_v54 }
  0xa2   :  { %4341 = vst [vmem:[#allocation32_spill] sm:$0xff] %v2186_v60  ;;  %v2188_v61 = vpop.permute.xlu1 %361 }
  0xa3   :  { %4342 = vst [vmem:[#allocation33_spill] sm:$0xff] %v2188_v61  ;;  %v360_v36 = vpop.permute.xlu0 %359  ;;  %vm457_vm0 = vcmp.lt.s32.totalorder %v2207_v57, 1  ;;  %vm61_vm1 = vcmp.ne.s32.totalorder %v2207_v57, 0  ;;  %vm842_vm3 = vcmp.lt.s32.totalorder %v2207_v57, 127 }
  0xa7   :  { %453 = vrot.lane.b32.xlu2 %v2192_v56, %s1890_s13 }
  0xa8   :  { %451 = vrot.lane.b32.xlu1 %v2190_v40, %s1890_s13 }
  0xa9   :  { %449 = vrot.lane.b32.xlu0 %v2194_v58, %s1890_s13  ;;  %v2202_v60 = vpop.permute.xlu2 %387 }
  0xaa   :  { %4346 = vst [vmem:[#allocation37_spill] sm:$0xff] %v2202_v60  ;;  %v2204_v61 = vpop.permute.xlu1 %367 }
  0xab   :  { %4347 = vst [vmem:[#allocation38_spill] sm:$0xff] %v2204_v61  ;;  %v366_v63 = vpop.permute.xlu0 %365 }
  0xaf   :  { %716 = vrot.lane.b32.xlu2 %v1926_v5, %s1891_s0 }
  0xb0   :  { %714 = vrot.lane.b32.xlu1 %v1914_v2, %s1891_s0 }
  0xb1   :  { %455 = vrot.lane.b32.xlu0 %v2209_v48, %s1890_s13  ;;  %v394_v61 = vpop.permute.xlu2 %393 }
  0xb2   :  { %v2218_v60 = vpop.permute.xlu1 %373  ;;  %v2223_v54 = vsel %vm457_vm0, %v2100_v50, %v394_v61  ;;  %v2228_v58 = vsel %vm457_vm0, %v394_v61, %v2100_v50 }
  0xb3   :  { %4348 = vst [vmem:[#allocation39_spill] sm:$0xff] %v2218_v60  ;;  %v372_v56 = vpop.permute.xlu0 %371 }
  0xb4   :  { %4349 = vst [vmem:[#allocation40_spill] sm:$0xff] %v2223_v54 }
  0xb5   :  { %4350 = vst [vmem:[#allocation41_spill] sm:$0xff] %v2228_v58 }
  0xb7   :  { %722 = vrot.lane.b32.xlu2 %v1910_v0, %s1891_s0 }
  0xb8   :  { %720 = vrot.lane.b32.xlu1 %v1924_v4, %s1891_s0 }
  0xb9   :  { %718 = vrot.lane.b32.xlu0 %v1912_v1, %s1891_s0  ;;  %v400_v40 = vpop.permute.xlu2 %399 }
  0xba   :  { %v2236_v60 = vpop.permute.xlu1 %379  ;;  %v2241_v54 = vsel %vm457_vm0, %v2116_v55, %v400_v40  ;;  %v2246_v50 = vsel %vm457_vm0, %v400_v40, %v2116_v55 }
  0xbb   :  { %4351 = vst [vmem:[#allocation42_spill] sm:$0xff] %v2236_v60  ;;  %v378_v61 = vpop.permute.xlu0 %377 }
  0xbc   :  { %4352 = vst [vmem:[#allocation43_spill] sm:$0xff] %v2241_v54 }
  0xbd   :  { %4353 = vst [vmem:[#allocation44_spill] sm:$0xff] %v2246_v50 }
  0xbf   :  { %728 = vrot.lane.b32.xlu2 %v1936_v7, %s1891_s0 }
  0xc0   :  { %726 = vrot.lane.b32.xlu1 %v1938_v8, %s1891_s0 }
  0xc1   :  { %724 = vrot.lane.b32.xlu0 %v1922_v3, %s1891_s0  ;;  %v406_v58 = vpop.permute.xlu2 %405 }
  0xc2   :  { %v2254_v60 = vpop.permute.xlu1 %385  ;;  %v2259_v54 = vsel %vm457_vm0, %v2136_v62, %v406_v58  ;;  %v2264_v40 = vsel %vm457_vm0, %v406_v58, %v2136_v62 }
  0xc3   :  { %4354 = vst [vmem:[#allocation45_spill] sm:$0xff] %v2254_v60  ;;  %v384_v55 = vpop.permute.xlu0 %383 }
  0xc4   :  { %4355 = vst [vmem:[#allocation46_spill] sm:$0xff] %v2259_v54 }
  0xc5   :  { %4356 = vst [vmem:[#allocation47_spill] sm:$0xff] %v2264_v40 }
  0xc7   :  { %734 = vrot.lane.b32.xlu2 %v1948_v10, %s1891_s0 }
  0xc8   :  { %732 = vrot.lane.b32.xlu1 %v1950_v11, %s1891_s0 }
  0xc9   :  { %730 = vrot.lane.b32.xlu0 %v1934_v6, %s1891_s0  ;;  %v412_v50 = vpop.permute.xlu2 %411 }
  0xca   :  { %v2272_v60 = vpop.permute.xlu1 %391  ;;  %v2277_v54 = vsel %vm457_vm0, %v2154_v44, %v412_v50  ;;  %v2282_v58 = vsel %vm457_vm0, %v412_v50, %v2154_v44 }
  0xcb   :  { %4357 = vst [vmem:[#allocation48_spill] sm:$0xff] %v2272_v60  ;;  %v390_v62 = vpop.permute.xlu0 %389 }
  0xcc   :  { %4358 = vst [vmem:[#allocation49_spill] sm:$0xff] %v2277_v54 }
  0xcd   :  { %4359 = vst [vmem:[#allocation50_spill] sm:$0xff] %v2282_v58 }
  0xcf   :  { %740 = vrot.lane.b32.xlu2 %v1960_v13, %s1891_s0 }
  0xd0   :  { %738 = vrot.lane.b32.xlu1 %v1962_v14, %s1891_s0 }
  0xd1   :  { %736 = vrot.lane.b32.xlu0 %v1946_v9, %s1891_s0  ;;  %v418_v40 = vpop.permute.xlu2 %417 }
  0xd2   :  { %v2290_v60 = vpop.permute.xlu1 %397  ;;  %v2295_v54 = vsel %vm457_vm0, %v2172_v49, %v418_v40  ;;  %v2300_v44 = vsel %vm457_vm0, %v418_v40, %v2172_v49 }
  0xd3   :  { %4360 = vst [vmem:[#allocation51_spill] sm:$0xff] %v2290_v60  ;;  %v2302_v50 = vpop.permute.xlu0 %395 }
  0xd4   :  { %4361 = vst [vmem:[#allocation52_spill] sm:$0xff] %v2295_v54 }
  0xd5   :  { %4362 = vst [vmem:[#allocation53_spill] sm:$0xff] %v2300_v44 }
  0xd7   :  { %746 = vrot.lane.b32.xlu2 %v1972_v16, %s1891_s0 }
  0xd8   :  { %744 = vrot.lane.b32.xlu1 %v1974_v17, %s1891_s0 }
  0xd9   :  { %742 = vrot.lane.b32.xlu0 %v1958_v12, %s1891_s0  ;;  %v424_v60 = vpop.permute.xlu2 %423 }
  0xda   :  { %v2310_v58 = vpop.permute.xlu1 %403  ;;  %v2314_v54 = vsel %vm457_vm0, %v360_v36, %v424_v60  ;;  %v2318_v49 = vsel %vm457_vm0, %v424_v60, %v360_v36 }
  0xdb   :  { %4363 = vst [vmem:[#allocation54_spill] sm:$0xff] %v2310_v58  ;;  %v2320_v40 = vpop.permute.xlu0 %401 }
  0xdc   :  { %4364 = vst [vmem:[#allocation55_spill] sm:$0xff] %v2314_v54 }
  0xdd   :  { %4365 = vst [vmem:[#allocation56_spill] sm:$0xff] %v2318_v49 }
  0xdf   :  { %752 = vrot.lane.b32.xlu2 %v1984_v19, %s1891_s0 }
  0xe0   :  { %750 = vrot.lane.b32.xlu1 %v1986_v20, %s1891_s0 }
  0xe1   :  { %748 = vrot.lane.b32.xlu0 %v1970_v15, %s1891_s0  ;;  %v430_v58 = vpop.permute.xlu2 %429 }
  0xe2   :  { %v2328_v44 = vpop.permute.xlu1 %409  ;;  %v2332_v54 = vsel %vm457_vm0, %v366_v63, %v430_v58  ;;  %v2336_v36 = vsel %vm457_vm0, %v430_v58, %v366_v63 }
  0xe3   :  { %4366 = vst [vmem:[#allocation57_spill] sm:$0xff] %v2328_v44  ;;  %v2338_v60 = vpop.permute.xlu0 %407 }
  0xe4   :  { %4367 = vst [vmem:[#allocation58_spill] sm:$0xff] %v2332_v54 }
  0xe5   :  { %4368 = vst [vmem:[#allocation59_spill] sm:$0xff] %v2336_v36 }
  0xe6   :  { %4369 = vst [vmem:[#allocation60_spill] sm:$0xff] %v2338_v60  ;;  %v2509_v60 = vmul.f32 2.0, %v1924_v4  ;;  %v4412_v4 = vld [vmem:[#allocation20_spill] sm:$0xff] }
  0xe7   :  { %758 = vrot.lane.b32.xlu2 %v1996_v22, %s1891_s0 }
  0xe8   :  { %756 = vrot.lane.b32.xlu1 %v1998_v23, %s1891_s0 }
  0xe9   :  { %754 = vrot.lane.b32.xlu0 %v1982_v18, %s1891_s0  ;;  %v436_v44 = vpop.permute.xlu2 %435 }
  0xea   :  { %v2346_v49 = vpop.permute.xlu1 %415  ;;  %v2350_v54 = vsel %vm457_vm0, %v372_v56, %v436_v44  ;;  %v2354_v63 = vsel %vm457_vm0, %v436_v44, %v372_v56 }
  0xeb   :  { %4370 = vst [vmem:[#allocation61_spill] sm:$0xff] %v2346_v49  ;;  %v2356_v58 = vpop.permute.xlu0 %413 }
  0xec   :  { %4371 = vst [vmem:[#allocation62_spill] sm:$0xff] %v2350_v54 }
  0xed   :  { %4372 = vst [vmem:[#allocation63_spill] sm:$0xff] %v2354_v63 }
  0xee   :  { %4373 = vst [vmem:[#allocation64_spill] sm:$0xff] %v2356_v58  ;;  %v2506_v58 = vmul.f32 2.0, %v1922_v3  ;;  %v4411_v3 = vld [vmem:[#allocation26_spill] sm:$0xff] }
  0xef   :  { %764 = vrot.lane.b32.xlu2 %v2008_v25, %s1891_s0 }
  0xf0   :  { %762 = vrot.lane.b32.xlu1 %v2010_v26, %s1891_s0 }
  0xf1   :  { %760 = vrot.lane.b32.xlu0 %v1994_v21, %s1891_s0  ;;  %v442_v49 = vpop.permute.xlu2 %441 }
  0xf2   :  { %v2364_v36 = vpop.permute.xlu1 %421  ;;  %v2368_v54 = vsel %vm457_vm0, %v378_v61, %v442_v49  ;;  %v2372_v56 = vsel %vm457_vm0, %v442_v49, %v378_v61 }
  0xf3   :  { %4374 = vst [vmem:[#allocation65_spill] sm:$0xff] %v2364_v36  ;;  %v2374_v44 = vpop.permute.xlu0 %419 }
  0xf4   :  { %4375 = vst [vmem:[#allocation66_spill] sm:$0xff] %v2368_v54 }
  0xf5   :  { %4376 = vst [vmem:[#allocation67_spill] sm:$0xff] %v2372_v56 }
  0xf6   :  { %4377 = vst [vmem:[#allocation68_spill] sm:$0xff] %v2374_v44 }
  0xf7   :  { %770 = vrot.lane.b32.xlu2 %v2020_v28, %s1891_s0 }
  0xf8   :  { %768 = vrot.lane.b32.xlu1 %v2022_v29, %s1891_s0 }
  0xf9   :  { %766 = vrot.lane.b32.xlu0 %v2006_v24, %s1891_s0  ;;  %v448_v63 = vpop.permute.xlu2 %447 }
  0xfa   :  { %v2382_v36 = vpop.permute.xlu1 %427  ;;  %v2386_v54 = vsel %vm457_vm0, %v384_v55, %v448_v63  ;;  %v2390_v61 = vsel %vm457_vm0, %v448_v63, %v384_v55 }
  0xfb   :  { %4378 = vst [vmem:[#allocation69_spill] sm:$0xff] %v2382_v36  ;;  %v2392_v49 = vpop.permute.xlu0 %425 }
  0xfc   :  { %4379 = vst [vmem:[#allocation70_spill] sm:$0xff] %v2386_v54 }
  0xfd   :  { %4380 = vst [vmem:[#allocation71_spill] sm:$0xff] %v2390_v61 }
  0xfe   :  { %4381 = vst [vmem:[#allocation72_spill] sm:$0xff] %v2392_v49 }
  0xff   :  { %776 = vrot.lane.b32.xlu2 %v2030_v30, %s1891_s0 }
 0x100   :  { %774 = vrot.lane.b32.xlu1 %v2034_v32, %s1891_s0 }
 0x101   :  { %772 = vrot.lane.b32.xlu0 %v2018_v27, %s1891_s0  ;;  %v454_v56 = vpop.permute.xlu2 %453 }
 0x102   :  { %v2400_v36 = vpop.permute.xlu1 %433  ;;  %v2404_v54 = vsel %vm457_vm0, %v390_v62, %v454_v56  ;;  %v2408_v55 = vsel %vm457_vm0, %v454_v56, %v390_v62 }
 0x103   :  { %4382 = vst [vmem:[#allocation73_spill] sm:$0xff] %v2400_v36  ;;  %v2410_v63 = vpop.permute.xlu0 %431 }
 0x104   :  { %4383 = vst [vmem:[#allocation74_spill] sm:$0xff] %v2404_v54 }
 0x105   :  { %4384 = vst [vmem:[#allocation75_spill] sm:$0xff] %v2408_v55 }
 0x106   :  { %4385 = vst [vmem:[#allocation76_spill] sm:$0xff] %v2410_v63 }
 0x107   :  { %782 = vrot.lane.b32.xlu2 %v2042_v33, %s1891_s0 }
 0x108   :  { %780 = vrot.lane.b32.xlu1 %v2046_v35, %s1891_s0 }
 0x109   :  { %778 = vrot.lane.b32.xlu0 %v2032_v31, %s1891_s0  ;;  %v2420_v36 = vpop.permute.xlu2 %716 }
 0x10a   :  { %v2418_v61 = vpop.permute.xlu1 %439  ;;  %4387 = vst [vmem:[#allocation78_spill] sm:$0xff] %v2420_v36 }
 0x10b   :  { %4386 = vst [vmem:[#allocation77_spill] sm:$0xff] %v2418_v61  ;;  %v2422_v54 = vpop.permute.xlu0 %437 }
 0x10c   :  { %4388 = vst [vmem:[#allocation79_spill] sm:$0xff] %v2422_v54 }
 0x10f   :  { %788 = vrot.lane.b32.xlu2 %v2056_v37, %s1891_s0 }
 0x110   :  { %786 = vrot.lane.b32.xlu1 %v2060_v39, %s1891_s0 }
 0x111   :  { %784 = vrot.lane.b32.xlu0 %v2044_v34, %s1891_s0  ;;  %v2432_v56 = vpop.permute.xlu2 %722 }
 0x112   :  { %v2430_v62 = vpop.permute.xlu1 %445  ;;  %4390 = vst [vmem:[#allocation81_spill] sm:$0xff] %v2432_v56 }
 0x113   :  { %4389 = vst [vmem:[#allocation80_spill] sm:$0xff] %v2430_v62  ;;  %v2434_v55 = vpop.permute.xlu0 %443 }
 0x114   :  { %4391 = vst [vmem:[#allocation82_spill] sm:$0xff] %v2434_v55 }
 0x117   :  { %794 = vrot.lane.b32.xlu2 %v2070_v41, %s1891_s0 }
 0x118   :  { %792 = vrot.lane.b32.xlu1 %v2074_v43, %s1891_s0 }
 0x119   :  { %790 = vrot.lane.b32.xlu0 %v2058_v38, %s1891_s0  ;;  %v2444_v54 = vpop.permute.xlu2 %728 }
 0x11a   :  { %v2442_v36 = vpop.permute.xlu1 %451  ;;  %4393 = vst [vmem:[#allocation84_spill] sm:$0xff] %v2444_v54 }
 0x11b   :  { %4392 = vst [vmem:[#allocation83_spill] sm:$0xff] %v2442_v36  ;;  %v2446_v61 = vpop.permute.xlu0 %449 }
 0x11c   :  { %4394 = vst [vmem:[#allocation85_spill] sm:$0xff] %v2446_v61 }
 0x11f   :  { %800 = vrot.lane.b32.xlu2 %v2084_v45, %s1891_s0 }
 0x120   :  { %798 = vrot.lane.b32.xlu1 %v2088_v47, %s1891_s0 }
 0x121   :  { %796 = vrot.lane.b32.xlu0 %v2072_v42, %s1891_s0  ;;  %v2454_v56 = vpop.permute.xlu2 %734 }
 0x122   :  { %4395 = vst [vmem:[#allocation86_spill] sm:$0xff] %v2454_v56  ;;  %v2456_v62 = vpop.permute.xlu1 %714 }
 0x123   :  { %4396 = vst [vmem:[#allocation87_spill] sm:$0xff] %v2456_v62  ;;  %v2458_v55 = vpop.permute.xlu0 %455 }
 0x124   :  { %4397 = vst [vmem:[#allocation88_spill] sm:$0xff] %v2458_v55 }
 0x127   :  { %804 = vrot.lane.b32.xlu2 %v2106_v53, %s1891_s0 }
 0x128   :  { %840 = vrot.lane.b32.xlu1 %v2209_v48, %s1891_s0 }
 0x129   :  { %802 = vrot.lane.b32.xlu0 %v2086_v46, %s1891_s0  ;;  %v2466_v54 = vpop.permute.xlu2 %740 }
 0x12a   :  { %4398 = vst [vmem:[#allocation89_spill] sm:$0xff] %v2466_v54  ;;  %v2468_v61 = vpop.permute.xlu1 %720  ;;  %v4404_v54 = vld [vmem:[#allocation21_spill] sm:$0xff] }
 0x12b   :  { %4399 = vst [vmem:[#allocation90_spill] sm:$0xff] %v2468_v61  ;;  %v2470_v36 = vpop.permute.xlu0 %718  ;;  %v4405_v61 = vld [vmem:[#allocation16_spill] sm:$0xff] }
 0x12c   :  { %4400 = vst [vmem:[#allocation91_spill] sm:$0xff] %v2470_v36  ;;  %v4406_v36 = vld [vmem:[#allocation15_spill] sm:$0xff] }
 0x12f   :  { %810 = vrot.lane.b32.xlu2 %v2124_v59, %s1891_s0 }
 0x130   :  { %808 = vrot.lane.b32.xlu1 %v2104_v52, %s1891_s0 }
 0x131   :  { %806 = vrot.lane.b32.xlu0 %v2102_v51, %s1891_s0  ;;  %v2478_v56 = vpop.permute.xlu2 %746 }
 0x132   :  { %4401 = vst [vmem:[#allocation92_spill] sm:$0xff] %v2478_v56  ;;  %v2480_v62 = vpop.permute.xlu1 %726  ;;  %v2497_v56 = vmul.f32 2.0, %v1910_v0  ;;  %v2518_v0 = vmul.f32 2.0, %v1936_v7  ;;  %v2537_v7 = vmul.f32 2.0, %v1958_v12 }
 0x133   :  { %4402 = vst [vmem:[#allocation93_spill] sm:$0xff] %v2480_v62  ;;  %v2482_v55 = vpop.permute.xlu0 %724  ;;  %v2500_v62 = vmul.f32 2.0, %v1912_v1  ;;  %v2521_v1 = vmul.f32 2.0, %v1938_v8  ;;  %v2540_v8 = vmul.f32 2.0, %v1960_v13  ;;  %v2561_v13 = vmul.f32 2.0, %v1982_v18 }
 0x134   :  { %4403 = vst [vmem:[#allocation94_spill] sm:$0xff] %v2482_v55  ;;  %v2503_v55 = vmul.f32 2.0, %v1914_v2  ;;  %v2524_v2 = vmul.f32 2.0, %v1946_v9  ;;  %v4415_v9 = vld [vmem:[#allocation19_spill] sm:$0xff]  ;;  %v2581_v18 = vmul.f32 2.0, %v2006_v24  ;;  %v587_v24 = vmul.f32 2.0, %v2032_v31 }
 0x135   :  { %4413 = vst [vmem:[#allocation26_spill] sm:$0xff] %v2537_v7  ;;  %v2621_v31 = vmul.f32 2.0, %v2070_v41  ;;  %v2638_v41 = vmul.f32 2.0, %v2088_v47  ;;  %v2657_v47 = vmul.f32 2.0, %v4406_v36 }
 0x136   :  { %4410 = vst [vmem:[#allocation95_spill] sm:$0xff] %v2524_v2  ;;  %v2548_v2 = vmul.f32 2.0, %v1970_v15  ;;  %v2570_v15 = vmul.f32 2.0, %v1994_v21  ;;  %v2590_v21 = vmul.f32 2.0, %v2018_v27  ;;  %v593_v27 = vmul.f32 2.0, %v2044_v34 }
 0x137   :  { %816 = vrot.lane.b32.xlu2 %v4404_v54, %s1891_s0  ;;  %4414 = vst [vmem:[#allocation20_spill] sm:$0xff] %v2540_v8  ;;  %v2564_v8 = vmul.f32 2.0, %v1984_v19  ;;  %v2584_v19 = vmul.f32 2.0, %v2008_v25  ;;  %v2603_v25 = vmul.f32 2.0, %v2034_v32  ;;  %v4433_v32 = vld [vmem:[#allocation31_spill] sm:$0xff]  ;;  %v605_v34 = vmul.f32 2.0, %v2072_v42 }
 0x138   :  { %814 = vrot.lane.b32.xlu1 %v4405_v61, %s1891_s0  ;;  %4416 = vst [vmem:[#allocation19_spill] sm:$0xff] %v2548_v2  ;;  %v4295_v42 = vmov 0.0   ;;  %v4450_v2 = vld [vmem:[#allocation34_spill] sm:$0xff] }
 0x139   :  { %812 = vrot.lane.b32.xlu0 %v4406_v36, %s1891_s0  ;;  %v2490_v63 = vpop.permute.xlu2 %752  ;;  %4419 = vst [vmem:[#allocation98_spill] sm:$0xff] %v2561_v13 }
 0x13a   :  { %4407 = vst [vmem:[#allocation21_spill] sm:$0xff] %v2490_v63  ;;  %v2492_v49 = vpop.permute.xlu1 %732  ;;  %v2512_v63 = vmul.f32 2.0, %v1926_v5  ;;  %v2531_v5 = vmul.f32 2.0, %v1948_v10  ;;  %v2551_v10 = vmul.f32 2.0, %v1972_v16 }
 0x13b   :  { %4408 = vst [vmem:[#allocation16_spill] sm:$0xff] %v2492_v49  ;;  %v2494_v44 = vpop.permute.xlu0 %730  ;;  %v2515_v49 = vmul.f32 2.0, %v1934_v6  ;;  %v2534_v6 = vmul.f32 2.0, %v1950_v11  ;;  %v2554_v11 = vmul.f32 2.0, %v1974_v17  ;;  %v2575_v17 = vmul.f32 2.0, %v1996_v22 }
 0x13c   :  { %4409 = vst [vmem:[#allocation15_spill] sm:$0xff] %v2494_v44  ;;  %v2545_v44 = vmul.f32 2.0, %v1962_v14  ;;  %v2567_v14 = vmul.f32 2.0, %v1986_v20  ;;  %v2587_v20 = vmul.f32 2.0, %v2010_v26  ;;  %v2596_v22 = vmul.f32 2.0, %v2022_v29 }
 0x13d   :  { %4420 = vst [vmem:[#allocation99_spill] sm:$0xff] %v2564_v8  ;;  %v2606_v26 = vmul.f32 2.0, %v2042_v33  ;;  %v599_v29 = vmul.f32 2.0, %v2058_v38  ;;  %v4434_v33 = vld [vmem:[#allocation25_spill] sm:$0xff]  ;;  %v611_v38 = vmul.f32 2.0, %v2086_v46  ;;  %v4457_v8 = vld [vmem:[#allocation50_spill] sm:$0xff] }
 0x13e   :  { %4421 = vst [vmem:[#allocation100_spill] sm:$0xff] %v2570_v15 }
 0x13f   :  { %822 = vrot.lane.b32.xlu2 %v4411_v3, %s1891_s0  ;;  %4423 = vst [vmem:[#allocation102_spill] sm:$0xff] %v2575_v17  ;;  %v4453_v17 = vld [vmem:[#allocation36_spill] sm:$0xff] }
 0x140   :  { %820 = vrot.lane.b32.xlu1 %v4412_v4, %s1891_s0  ;;  %4425 = vst [vmem:[#allocation104_spill] sm:$0xff] %v2581_v18  ;;  %v2654_v18 = vmul.f32 2.0, %v2106_v53  ;;  %v2674_v53 = vmul.f32 2.0, %v4404_v54  ;;  %v4446_v54 = vld [vmem:[#allocation44_spill] sm:$0xff] }
 0x141   :  { %818 = vrot.lane.b32.xlu0 %v4415_v9, %s1891_s0  ;;  %v2556_v12 = vpop.permute.xlu2 %758  ;;  %4426 = vst [vmem:[#allocation105_spill] sm:$0xff] %v2584_v19  ;;  %v2702_v19 = vmul.f32 2.0, %v4433_v32 }
 0x142   :  { %4417 = vst [vmem:[#allocation96_spill] sm:$0xff] %v2556_v12  ;;  %v2558_v7 = vpop.permute.xlu1 %738  ;;  %v2578_v12 = vmul.f32 2.0, %v1998_v23  ;;  %v2599_v23 = vmul.f32 2.0, %v2030_v30  ;;  %v2618_v30 = vmul.f32 2.0, %v2060_v39  ;;  %v4435_v39 = vld [vmem:[#allocation24_spill] sm:$0xff] }
 0x143   :  { %4418 = vst [vmem:[#allocation97_spill] sm:$0xff] %v2558_v7  ;;  %v2572_v16 = vpop.permute.xlu0 %736  ;;  %v2593_v7 = vmul.f32 2.0, %v2020_v28  ;;  %v2614_v28 = vmul.f32 2.0, %v2056_v37  ;;  %v2632_v37 = vmul.f32 2.0, %v2084_v45  ;;  %v2677_v36 = vmul.f32 2.0, %v4435_v39 }
 0x144   :  { %4422 = vst [vmem:[#allocation101_spill] sm:$0xff] %v2572_v16  ;;  %v2610_v16 = vmul.f32 2.0, %v2046_v35  ;;  %v2629_v35 = vmul.f32 2.0, %v2074_v43  ;;  %v2647_v43 = vsel %vm61_vm1, 1.0, %v4295_v42  ;;  %v2668_v42 = vmul.f32 2.0, %v4415_v9  ;;  %v4444_v9 = vld [vmem:[#allocation41_spill] sm:$0xff] }
 0x145   :  { %4424 = vst [vmem:[#allocation103_spill] sm:$0xff] %v2578_v12  ;;  %v528_v13 = vmul.f32 %v2647_v43, %v4446_v54  ;;  %v2714_v54 = vmul.f32 2.0, %v2209_v48 }
 0x146   :  { %4427 = vst [vmem:[#allocation106_spill] sm:$0xff] %v2587_v20  ;;  %v4449_v20 = vld [vmem:[#allocation51_spill] sm:$0xff] }
 0x147   :  { %4428 = vst [vmem:[#allocation107_spill] sm:$0xff] %v2590_v21  ;;  %828 = vrot.lane.b32.xlu2 %v4433_v32, %s1891_s0  ;;  %v2641_v21 = vmul.f32 2.0, %v2102_v51  ;;  %v2660_v51 = vmul.f32 2.0, %v4405_v61  ;;  %v2680_v61 = vmul.f32 2.0, %v4434_v33  ;;  %v4458_v32 = vld [vmem:[#allocation14_spill] sm:$0xff] }
 0x148   :  { %4429 = vst [vmem:[#allocation108_spill] sm:$0xff] %v2593_v7  ;;  %826 = vrot.lane.b32.xlu1 %v4434_v33, %s1891_s0  ;;  %v522_v7 = vmul.f32 %v2647_v43, %v4444_v9  ;;  %v4448_v33 = vld [vmem:[#allocation12_spill] sm:$0xff]  ;;  %v4452_v9 = vld [vmem:[#allocation35_spill] sm:$0xff] }
 0x149   :  { %4430 = vst [vmem:[#allocation109_spill] sm:$0xff] %v2596_v22  ;;  %824 = vrot.lane.b32.xlu0 %v4435_v39, %s1891_s0  ;;  %v2649_v45 = vpop.permute.xlu2 %764  ;;  %v4447_v39 = vld [vmem:[#allocation47_spill] sm:$0xff]  ;;  %v2708_v12 = vmul.f32 2.0, %v4452_v9 }
 0x14a   :  { %4431 = vst [vmem:[#allocation110_spill] sm:$0xff] %v2599_v23  ;;  %v2651_v46 = vpop.permute.xlu1 %744  ;;  %v534_v23 = vmul.f32 %v2647_v43, %v4447_v39  ;;  %v4455_v39 = vld [vmem:[#allocation40_spill] sm:$0xff] }
 0x14b   :  { %4432 = vst [vmem:[#allocation111_spill] sm:$0xff] %v2603_v25  ;;  %v617_v25 = vmul.f32 2.0, %v2104_v52  ;;  %v2663_v52 = vmul.f32 2.0, %v2124_v59  ;;  %v2665_v15 = vpop.permute.xlu0 %742  ;;  %v2683_v59 = vmul.f32 2.0, %v4411_v3  ;;  %v492_v3 = vsel %vm457_vm0, %v4449_v20, %v4448_v33 }
 0x14c   :  { %4436 = vst [vmem:[#allocation31_spill] sm:$0xff] %v2649_v45  ;;  %v2671_v45 = vmul.f32 2.0, %v4412_v4  ;;  %v4445_v4 = vld [vmem:[#allocation30_spill] sm:$0xff] }
 0x14d   :  { %4437 = vst [vmem:[#allocation25_spill] sm:$0xff] %v2651_v46  ;;  %v4442_v46 = vld [vmem:[#allocation29_spill] sm:$0xff]  ;;  %v2691_v22 = vmul.f32 2.0, %v4445_v4 }
 0x14e   :  { %4438 = vst [vmem:[#allocation24_spill] sm:$0xff] %v2665_v15  ;;  %v2686_v15 = vmul.f32 2.0, %v4442_v46 }
 0x14f   :  { %4439 = vst [vmem:[#allocation112_spill] sm:$0xff] %v2674_v53  ;;  %v540_v53 = vmul.f32 %v2647_v43, %v4457_v8  ;;  %834 = vrot.lane.b32.xlu2 %v4453_v17, %s1891_s0  ;;  %v526_v8 = vmul.f32 %v2647_v43, %v492_v3  ;;  %v4466_v3 = vld [vmem:[#allocation54_spill] sm:$0xff] }
 0x150   :  { %4440 = vst [vmem:[#allocation113_spill] sm:$0xff] %v2677_v36  ;;  %v2717_v36 = vadd.f32 %v587_v24, %v4455_v39  ;;  %832 = vrot.lane.b32.xlu1 %v4445_v4, %s1891_s0  ;;  %v460_v24 = vsel %vm457_vm0, %v4448_v33, %v4449_v20  ;;  %v2740_v39 = vadd.f32 %v2503_v55, %v522_v7  ;;  %v4463_v55 = vld [vmem:[#allocation49_spill] sm:$0xff] }
 0x151   :  { %4441 = vst [vmem:[#allocation114_spill] sm:$0xff] %v2683_v59  ;;  %v2711_v59 = vmul.f32 2.0, %v4453_v17  ;;  %830 = vrot.lane.b32.xlu0 %v4442_v46, %s1891_s0  ;;  %v4460_v17 = vld [vmem:[#allocation46_spill] sm:$0xff]  ;;  %v2754_v20 = vadd.f32 %v2509_v60, %v528_v13  ;;  %v2757_v46 = vadd.f32 %v2521_v1, %v534_v23  ;;  %v2760_v7 = vadd.f32 %v605_v34, %v4463_v55  ;;  %v4465_v33 = vld [vmem:[#allocation9_spill] sm:$0xff]  ;;  %v4470_v55 = vld [vmem:[#allocation52_spill] sm:$0xff] }
 0x152   :  { %4443 = vst [vmem:[#allocation29_spill] sm:$0xff] %v2686_v15  ;;  %v2705_v15 = vmul.f32 2.0, %v4450_v2  ;;  %v2751_v4 = vpop.permute.xlu1 %750  ;;  %v2774_v1 = vadd.f32 %v2606_v26, %v460_v24  ;;  %v4469_v13 = vld [vmem:[#allocation53_spill] sm:$0xff]  ;;  %v2783_v34 = vadd.f32 %v2534_v6, %v540_v53  ;;  %v4474_v53 = vld [vmem:[#allocation18_spill] sm:$0xff] }
 0x153   :  { %4454 = vst [vmem:[#allocation30_spill] sm:$0xff] %v2711_v59  ;;  %v4459_v59 = vld [vmem:[#allocation43_spill] sm:$0xff]  ;;  %v2771_v60 = vpop.permute.xlu0 %748  ;;  %v546_v23 = vmul.f32 %v2647_v43, %v4469_v13  ;;  %v4473_v26 = vld [vmem:[#allocation57_spill] sm:$0xff]  ;;  %v2796_v13 = vadd.f32 %v2500_v62, %v526_v8 }
 0x154   :  { %4451 = vst [vmem:[#allocation41_spill] sm:$0xff] %v2705_v15  ;;  %v491_v15 = vsel %vm457_vm0, %v2302_v50, %v4458_v32  ;;  %v2730_v48 = vadd.f32 %v593_v27, %v4459_v59  ;;  %v459_v27 = vsel %vm457_vm0, %v4458_v32, %v2302_v50  ;;  %v2749_v59 = vpop.permute.xlu2 %770  ;;  %v495_v50 = vsel %vm457_vm0, %v4466_v3, %v4465_v33  ;;  %v4467_v32 = vld [vmem:[#allocation8_spill] sm:$0xff]  ;;  %v4477_v8 = vld [vmem:[#allocation55_spill] sm:$0xff] }
 0x155   :  { %4456 = vst [vmem:[#allocation44_spill] sm:$0xff] %v2717_v36  ;;  %v2743_v36 = vadd.f32 %v599_v29, %v4460_v17  ;;  %v524_v29 = vmul.f32 %v2647_v43, %v491_v15  ;;  %v494_v17 = vsel %vm457_vm0, %v2320_v40, %v4467_v32  ;;  %v463_v15 = vsel %vm457_vm0, %v4465_v33, %v4466_v3  ;;  %v4476_v3 = vld [vmem:[#allocation56_spill] sm:$0xff] }
 0x156   :  { %4461 = vst [vmem:[#allocation47_spill] sm:$0xff] %v2749_v59  ;;  %v2789_v59 = vadd.f32 %v2610_v16, %v459_v27  ;;  %v462_v6 = vsel %vm457_vm0, %v4467_v32, %v2320_v40  ;;  %v4475_v16 = vld [vmem:[#allocation60_spill] sm:$0xff]  ;;  %v2809_v33 = vadd.f32 %v2614_v28, %v463_v15  ;;  %v552_v62 = vmul.f32 %v2647_v43, %v4476_v3  ;;  %v4482_v15 = vld [vmem:[#allocation23_spill] sm:$0xff]  ;;  %v4486_v3 = vld [vmem:[#allocation58_spill] sm:$0xff] }
 0x157   :  { %4462 = vst [vmem:[#allocation12_spill] sm:$0xff] %v2751_v4  ;;  %v2786_v4 = vadd.f32 %v611_v38, %v4470_v55  ;;  %v530_v38 = vmul.f32 %v2647_v43, %v494_v17  ;;  %v497_v27 = vsel %vm457_vm0, %v4475_v16, %v4474_v53  ;;  %v2817_v55 = vadd.f32 %v2512_v63, %v524_v29  ;;  %v4479_v17 = vld [vmem:[#allocation11_spill] sm:$0xff] }
 0x158   :  { %4464 = vst [vmem:[#allocation51_spill] sm:$0xff] %v2760_v7  ;;  %v532_v7 = vmul.f32 %v2647_v43, %v495_v50  ;;  %v2814_v50 = vadd.f32 %v617_v25, %v4477_v8  ;;  %838 = vrot.lane.b32.xlu1 %v4452_v9, %s1891_s0  ;;  %v2831_v25 = vadd.f32 %v2545_v44, %v546_v23  ;;  %v60_v23 = vadd.s32 128, %v2207_v57 }
 0x159   :  { %4468 = vst [vmem:[#allocation34_spill] sm:$0xff] %v2771_v60  ;;  %v4472_v60 = vld [vmem:[#allocation10_spill] sm:$0xff]  ;;  %v2834_v63 = vadd.f32 %v2618_v30, %v462_v6  ;;  %v465_v29 = vsel %vm457_vm0, %v4474_v53, %v4475_v16  ;;  %836 = vrot.lane.b32.xlu0 %v4450_v2, %s1891_s0  ;;  %v2860_v53 = vadd.f32 %v2497_v56, %v530_v38  ;;  %v4485_v2 = vld [vmem:[#allocation59_spill] sm:$0xff] }
 0x15a   :  { %4471 = vst [vmem:[#allocation35_spill] sm:$0xff] %v2786_v4  ;;  %v498_v24 = vsel %vm457_vm0, %v4473_v26, %v4472_v60  ;;  %v466_v40 = vsel %vm457_vm0, %v4472_v60, %v4473_v26  ;;  %v4480_v4 = vld [vmem:[#allocation61_spill] sm:$0xff]  ;;  %v536_v60 = vmul.f32 %v2647_v43, %v497_v27  ;;  %v4483_v26 = vld [vmem:[#allocation64_spill] sm:$0xff]  ;;  %v2853_v9 = vpop.permute.xlu1 %756  ;;  %v2857_v6 = vadd.f32 %v2506_v58, %v532_v7  ;;  %v4489_v38 = vld [vmem:[#allocation63_spill] sm:$0xff] }
 0x15b   :  { %4478 = vst [vmem:[#allocation36_spill] sm:$0xff] %v2814_v50  ;;  %v538_v32 = vmul.f32 %v2647_v43, %v498_v24  ;;  %v501_v28 = vsel %vm457_vm0, %v4480_v4, %v4479_v17  ;;  %v500_v24 = vsel %vm457_vm0, %v4483_v26, %v4482_v15  ;;  %v469_v44 = vsel %vm457_vm0, %v4479_v17, %v4480_v4  ;;  %v2872_v17 = vpop.permute.xlu0 %754 }
 0x15c   :  { %4481 = vst [vmem:[#allocation40_spill] sm:$0xff] %v2831_v25  ;;  %v2851_v30 = vpop.permute.xlu2 %776  ;;  %v2863_v16 = vadd.f32 %v2621_v31, %v466_v40  ;;  %v558_v27 = vmul.f32 %v2647_v43, %v4485_v2  ;;  %v2869_v4 = vadd.f32 %v2660_v51, %v4486_v3  ;;  %v544_v8 = vmul.f32 %v2647_v43, %v501_v28  ;;  %v4490_v28 = vld [vmem:[#allocation28_spill] sm:$0xff] }
 0x15d   :  { %4484 = vst [vmem:[#allocation50_spill] sm:$0xff] %v2853_v9  ;;  %v2875_v58 = vadd.f32 %v2629_v35, %v465_v29  ;;  %v468_v56 = vsel %vm457_vm0, %v4482_v15, %v4483_v26  ;;  %v542_v31 = vmul.f32 %v2647_v43, %v500_v24  ;;  %v2883_v7 = vadd.f32 %v2515_v49, %v538_v32  ;;  %v4491_v35 = vld [vmem:[#allocation68_spill] sm:$0xff]  ;;  %v4492_v15 = vld [vmem:[#allocation62_spill] sm:$0xff]  ;;  %v4494_v49 = vld [vmem:[#allocation65_spill] sm:$0xff] }
 0x15e   :  { %4487 = vst [vmem:[#allocation14_spill] sm:$0xff] %v2869_v4  ;;  %v2886_v51 = vadd.f32 %v2632_v37, %v469_v44  ;;  %v2890_v40 = vmul.f32 %v2647_v43, %v4489_v38  ;;  %v503_v29 = vsel %vm457_vm0, %v4491_v35, %v4490_v28  ;;  %v2897_v2 = vadd.f32 %v2518_v0, %v536_v60  ;;  %v4495_v32 = vld [vmem:[#allocation13_spill] sm:$0xff] }
 0x15f   :  { %4488 = vst [vmem:[#allocation43_spill] sm:$0xff] %v2872_v17  ;;  %v2901_v26 = vadd.f32 %v2671_v45, %v4492_v15  ;;  %v472_v37 = vsel %vm457_vm0, %v4495_v32, %v4494_v49  ;;  %v504_v24 = vsel %vm457_vm0, %v4494_v49, %v4495_v32  ;;  %vm68_vm2 = vcmp.ne.s32.totalorder %v60_v23, 255  ;;  %v4496_v45 = vld [vmem:[#allocation95_spill] sm:$0xff]  ;;  %v4498_v15 = vld [vmem:[#allocation33_spill] sm:$0xff] }
 0x160   :  { %v2912_v44 = vadd.f32 %v2638_v41, %v468_v56  ;;  %v471_v0 = vsel %vm457_vm0, %v4490_v28, %v4491_v35  ;;  %v2919_v60 = vadd.f32 %v4496_v45, %v544_v8  ;;  %v2922_v3 = vadd.f32 %v2554_v11, %v552_v62  ;;  %v4501_v28 = vld [vmem:[#allocation67_spill] sm:$0xff] }
 0x161   :  { %4493 = vst [vmem:[#allocation46_spill] sm:$0xff] %v2901_v26  ;;  %v548_v38 = vmul.f32 %v2647_v43, %v503_v29  ;;  %v4499_v26 = vld [vmem:[#allocation72_spill] sm:$0xff]  ;;  %v2931_v41 = vadd.f32 %v2531_v5, %v542_v31  ;;  %v550_v56 = vmul.f32 %v2647_v43, %v504_v24  ;;  %v2935_v8 = vadd.f32 %v2641_v21, %v472_v37  ;;  %v4503_v29 = vld [vmem:[#allocation66_spill] sm:$0xff]  ;;  %v4505_v5 = vld [vmem:[#allocation69_spill] sm:$0xff] }
 0x162   :  { %4497 = vst [vmem:[#allocation49_spill] sm:$0xff] %v2922_v3  ;;  %v506_v23 = vsel %vm457_vm0, %v4499_v26, %v4498_v15  ;;  %v2939_v11 = vmul.f32 %v2647_v43, %v4501_v28  ;;  %v4502_v62 = vmov 0.0   ;;  %v2946_v49 = vadd.f32 %v2680_v61, %v4503_v29  ;;  %v4506_v31 = vld [vmem:[#allocation17_spill] sm:$0xff]  ;;  %v2959_v45 = vpop.permute.xlu1 %762  ;;  %v4508_v61 = vld [vmem:[#allocation38_spill] sm:$0xff]  ;;  %v4509_v29 = vld [vmem:[#allocation76_spill] sm:$0xff] }
 0x163   :  { %4500 = vst [vmem:[#allocation9_spill] sm:$0xff] %v2935_v8  ;;  %v2942_v35 = vsel %vm68_vm2, 1.0, %v4502_v62  ;;  %v2949_v32 = vadd.f32 %v2654_v18, %v471_v0  ;;  %v475_v21 = vsel %vm457_vm0, %v4506_v31, %v4505_v5  ;;  %v507_v37 = vsel %vm457_vm0, %v4505_v5, %v4506_v31  ;;  %v4510_v0 = vld [vmem:[#allocation91_spill] sm:$0xff]  ;;  %v2972_v4 = vpop.permute.xlu0 %760 }
 0x164   :  { %4504 = vst [vmem:[#allocation54_spill] sm:$0xff] %v2946_v49  ;;  %v783_v24 = vpop.permute.xlu2 %782  ;;  %v554_v28 = vmul.f32 %v2647_v43, %v506_v23  ;;  %v509_v18 = vsel %vm457_vm0, %v4509_v29, %v4508_v61  ;;  %v474_v23 = vsel %vm457_vm0, %v4498_v15, %v4499_v26  ;;  %v556_v8 = vmul.f32 %v2647_v43, %v507_v37 }
 0x165   :  { %4507 = vst [vmem:[#allocation8_spill] sm:$0xff] %v2959_v45  ;;  %v845_v49 = vsel %vm842_vm3, %v4510_v0, %v783_v24  ;;  %v877_v17 = vsel %vm842_vm3, %v783_v24, %v4510_v0  ;;  %v4512_v45 = vld [vmem:[#allocation20_spill] sm:$0xff]  ;;  %v2987_v50 = vadd.f32 %v2657_v47, %v475_v21  ;;  %v4514_v24 = vld [vmem:[#allocation73_spill] sm:$0xff]  ;;  %v4515_v0 = vld [vmem:[#allocation22_spill] sm:$0xff]  ;;  %v560_v47 = vmul.f32 %v2647_v43, %v509_v18 }
 0x166   :  { %4511 = vst [vmem:[#allocation53_spill] sm:$0xff] %v2972_v4  ;;  %v912_v5 = vmul.f32 %v2942_v35, %v877_v17  ;;  %v2980_v31 = vadd.f32 %v845_v49, %v2796_v13  ;;  %v2983_v9 = vadd.f32 %v4512_v45, %v548_v38  ;;  %v478_v4 = vsel %vm457_vm0, %v4515_v0, %v4514_v24  ;;  %v4516_v13 = vld [vmem:[#allocation71_spill] sm:$0xff]  ;;  %v4517_v38 = vld [vmem:[#allocation70_spill] sm:$0xff] }
 0x167   :  { %4513 = vst [vmem:[#allocation52_spill] sm:$0xff] %v2987_v50  ;;  %v510_v17 = vsel %vm457_vm0, %v4514_v24, %v4515_v0  ;;  %v2999_v26 = vmul.f32 %v2647_v43, %v4516_v13  ;;  %v3003_v15 = vadd.f32 %v2691_v22, %v4517_v38  ;;  %v3008_v21 = vadd.f32 %v2663_v52, %v474_v23  ;;  %v4523_v23 = vld [vmem:[#allocation39_spill] sm:$0xff]  ;;  %v4529_v13 = vld [vmem:[#allocation42_spill] sm:$0xff] }
 0x168   :  { %v976_v49 = vadd.f32 %v912_v5, %v2774_v1  ;;  %v477_v37 = vsel %vm457_vm0, %v4508_v61, %v4509_v29  ;;  %v3015_v45 = vadd.f32 %v2551_v10, %v554_v28  ;;  %v3018_v24 = vadd.f32 %v2567_v14, %v558_v27  ;;  %v4521_v1 = vld [vmem:[#allocation27_spill] sm:$0xff]  ;;  %v4522_v5 = vld [vmem:[#allocation77_spill] sm:$0xff]  ;;  %v4526_v14 = vld [vmem:[#allocation74_spill] sm:$0xff] }
 0x169   :  { %4518 = vst [vmem:[#allocation10_spill] sm:$0xff] %v3003_v15  ;;  %v562_v22 = vmul.f32 %v2647_v43, %v510_v17  ;;  %v3022_v18 = vadd.f32 %v2668_v42, %v478_v4  ;;  %v513_v52 = vsel %vm457_vm0, %v4522_v5, %v4521_v1  ;;  %v4524_v0 = vld [vmem:[#allocation79_spill] sm:$0xff]  ;;  %v3038_v27 = vadd.f32 %v2708_v12, %v4526_v14  ;;  %v4528_v29 = vld [vmem:[#allocation112_spill] sm:$0xff]  ;;  %v4530_v38 = vld [vmem:[#allocation82_spill] sm:$0xff] }
 0x16a   :  { %4519 = vst [vmem:[#allocation57_spill] sm:$0xff] %v3018_v24  ;;  %v512_v61 = vsel %vm457_vm0, %v4524_v0, %v4523_v23  ;;  %v4525_v10 = vld [vmem:[#allocation75_spill] sm:$0xff]  ;;  %v481_v42 = vsel %vm457_vm0, %v4521_v1, %v4522_v5  ;;  %v480_v4 = vsel %vm457_vm0, %v4523_v23, %v4524_v0  ;;  %v3049_v17 = vadd.f32 %v4528_v29, %v477_v37  ;;  %v3055_v14 = vpop.permute.xlu1 %768  ;;  %v4533_v1 = vld [vmem:[#allocation26_spill] sm:$0xff]  ;;  %v4541_v24 = vld [vmem:[#allocation32_spill] sm:$0xff] }
 0x16b   :  { %4520 = vst [vmem:[#allocation18_spill] sm:$0xff] %v3022_v18  ;;  %v3034_v28 = vmul.f32 %v2647_v43, %v4525_v10  ;;  %v515_v10 = vsel %vm457_vm0, %v4530_v38, %v4529_v13  ;;  %v3061_v5 = vadd.f32 %v4533_v1, %v550_v56  ;;  %v568_v18 = vmul.f32 %v2647_v43, %v513_v52  ;;  %v4535_v37 = vld [vmem:[#allocation94_spill] sm:$0xff]  ;;  %v3071_v50 = vpop.permute.xlu0 %766  ;;  %v4540_v1 = vld [vmem:[#allocation80_spill] sm:$0xff] }
 0x16c   :  { %4527 = vst [vmem:[#allocation60_spill] sm:$0xff] %v3038_v27  ;;  %v789_v12 = vpop.permute.xlu2 %788  ;;  %v4532_v27 = vld [vmem:[#allocation99_spill] sm:$0xff]  ;;  %v566_v23 = vmul.f32 %v2647_v43, %v512_v61 }
 0x16d   :  { %4531 = vst [vmem:[#allocation56_spill] sm:$0xff] %v3055_v14  ;;  %v3058_v15 = vadd.f32 %v4532_v27, %v560_v47  ;;  %v848_v0 = vsel %vm842_vm3, %v4535_v37, %v789_v12  ;;  %v880_v29 = vsel %vm842_vm3, %v789_v12, %v4535_v37  ;;  %v4537_v14 = vld [vmem:[#allocation113_spill] sm:$0xff]  ;;  %v4539_v27 = vld [vmem:[#allocation114_spill] sm:$0xff]  ;;  %v516_v12 = vsel %vm457_vm0, %v4540_v1, %v4541_v24 }
 0x16e   :  { %4534 = vst [vmem:[#allocation55_spill] sm:$0xff] %v3061_v5  ;;  %v3074_v47 = vadd.f32 %v4537_v14, %v481_v42  ;;  %v3077_v56 = vadd.f32 %v4539_v27, %v480_v4  ;;  %v918_v52 = vmul.f32 %v2942_v35, %v880_v29  ;;  %v981_v61 = vadd.f32 %v848_v0, %v2857_v6  ;;  %v4542_v14 = vld [vmem:[#allocation83_spill] sm:$0xff]  ;;  %v4543_v37 = vld [vmem:[#allocation37_spill] sm:$0xff]  ;;  %v4544_v29 = vld [vmem:[#allocation48_spill] sm:$0xff] }
 0x16f   :  { %4536 = vst [vmem:[#allocation11_spill] sm:$0xff] %v3071_v50  ;;  %v484_v5 = vsel %vm457_vm0, %v4541_v24, %v4540_v1  ;;  %v483_v42 = vsel %vm457_vm0, %v4529_v13, %v4530_v38  ;;  %v572_v4 = vmul.f32 %v2647_v43, %v515_v10  ;;  %v487_v6 = vsel %vm457_vm0, %v4543_v37, %v4542_v14  ;;  %v4545_v27 = vld [vmem:[#allocation88_spill] sm:$0xff]  ;;  %v4546_v13 = vld [vmem:[#allocation85_spill] sm:$0xff] }
 0x170   :  { %4538 = vst [vmem:[#allocation61_spill] sm:$0xff] %v3074_v47  ;;  %v519_v0 = vsel %vm457_vm0, %v4542_v14, %v4543_v37  ;;  %v521_v24 = vsel %vm457_vm0, %v4545_v27, %v4544_v29  ;;  %v982_v1 = vadd.f32 %v918_v52, %v2809_v33  ;;  %v4547_v38 = vld [vmem:[#allocation45_spill] sm:$0xff]  ;;  %v4548_v47 = vld [vmem:[#allocation102_spill] sm:$0xff]  ;;  %v4549_v14 = vld [vmem:[#allocation103_spill] sm:$0xff]  ;;  %v574_v62 = vmul.f32 %v2647_v43, %v516_v12 }
 0x171   :  { %v486_v10 = vsel %vm457_vm0, %v4547_v38, %v4546_v13  ;;  %v518_v50 = vsel %vm457_vm0, %v4546_v13, %v4547_v38  ;;  %v3116_v3 = vadd.f32 %v4548_v47, %v566_v23  ;;  %v3120_v37 = vadd.f32 %v4549_v14, %v2890_v40  ;;  %v4551_v33 = vld [vmem:[#allocation29_spill] sm:$0xff]  ;;  %v4556_v14 = vld [vmem:[#allocation19_spill] sm:$0xff] }
 0x172   :  { %v3124_v52 = vadd.f32 %v4551_v33, %v484_v5  ;;  %v3127_v25 = vadd.f32 %v2702_v19, %v483_v42  ;;  %v489_v13 = vsel %vm457_vm0, %v4544_v29, %v4545_v27  ;;  %v580_v23 = vmul.f32 %v2647_v43, %v519_v0  ;;  %v4554_v47 = vld [vmem:[#allocation41_spill] sm:$0xff]  ;;  %v4558_v33 = vld [vmem:[#allocation30_spill] sm:$0xff] }
 0x173   :  { %4550 = vst [vmem:[#allocation23_spill] sm:$0xff] %v3120_v37  ;;  %v3135_v38 = vadd.f32 %v4554_v47, %v487_v6  ;;  %v584_v40 = vmul.f32 %v2647_v43, %v521_v24  ;;  %v3139_v12 = vadd.f32 %v4556_v14, %v556_v8  ;;  %v578_v5 = vmul.f32 %v2647_v43, %v518_v50  ;;  %v4561_v37 = vld [vmem:[#allocation105_spill] sm:$0xff]  ;;  %v4563_v0 = vld [vmem:[#allocation106_spill] sm:$0xff]  ;;  %v4566_v43 = vld [vmem:[#allocation15_spill] sm:$0xff] }
 0x174   :  { %4552 = vst [vmem:[#allocation64_spill] sm:$0xff] %v3124_v52  ;;  %v3143_v19 = vadd.f32 %v4558_v33, %v486_v10  ;;  %v795_v42 = vpop.permute.xlu2 %794  ;;  %v3145_v52 = vpop.permute.xlu1 %774  ;;  %v3148_v29 = vadd.f32 %v4561_v37, %v572_v4  ;;  %v3152_v6 = vadd.f32 %v4563_v0, %v2939_v11  ;;  %v3155_v27 = vadd.f32 %v2714_v54, %v489_v13  ;;  %v4569_v47 = vld [vmem:[#allocation110_spill] sm:$0xff] }
 0x175   :  { %4553 = vst [vmem:[#allocation59_spill] sm:$0xff] %v3127_v25  ;;  %v3158_v8 = vmul.f32 0.25, %v2980_v31  ;;  %v851_v50 = vsel %vm842_vm3, %v4566_v43, %v795_v42  ;;  %v883_v24 = vsel %vm842_vm3, %v795_v42, %v4566_v43  ;;  %v3166_v4 = vpop.permute.xlu0 %772  ;;  %v3168_v10 = vmul.f32 0.25, %v976_v49  ;;  %v4571_v33 = vld [vmem:[#allocation98_spill] sm:$0xff]  ;;  %v4573_v42 = vld [vmem:[#allocation109_spill] sm:$0xff] }
 0x176   :  { %4555 = vst [vmem:[#allocation58_spill] sm:$0xff] %v3135_v38  ;;  %v924_v11 = vmul.f32 %v2942_v35, %v883_v24  ;;  %v987_v54 = vadd.f32 %v851_v50, %v2883_v7  ;;  %v4568_v37 = vlaneseq  ;;  %v3175_v31 = vmul.f32 0.25, %v981_v61  ;;  %v4575_v7 = vld [vmem:[#allocation108_spill] sm:$0xff] }
 0x177   :  { %4557 = vst [vmem:[#allocation63_spill] sm:$0xff] %v3139_v12  ;;  %v3178_v14 = vadd.f32 %v4569_v47, %v584_v40  ;;  %v3181_v0 = vadd.f32 %v4571_v33, %v562_v22  ;;  %v3185_v43 = vadd.f32 %v4573_v42, %v2999_v26  ;;  %v3187_v49 = vmul.f32 0.25, %v982_v1  ;;  %v4579_v47 = vld [vmem:[#allocation104_spill] sm:$0xff]  ;;  %v4581_v22 = vld [vmem:[#allocation111_spill] sm:$0xff] }
 0x178   :  { %4559 = vst [vmem:[#allocation28_spill] sm:$0xff] %v3143_v19  ;;  %v3173_v13 = vshrl.u32 %v4568_v37, 7  ;;  %v988_v24 = vadd.f32 %v924_v11, %v2863_v16  ;;  %v3191_v50 = vadd.f32 %v4575_v7, %v578_v5  ;;  %v4577_v37 = vld [vmem:[#allocation100_spill] sm:$0xff]  ;;  %v3198_v38 = vadd.f32 %v4579_v47, %v574_v62  ;;  %v4583_v26 = vld [vmem:[#allocation107_spill] sm:$0xff]  ;;  %v4585_v16 = vld [vmem:[#allocation101_spill] sm:$0xff] }
 0x179   :  { %4560 = vst [vmem:[#allocation68_spill] sm:$0xff] %v3145_v52  ;;  %v3194_v61 = vadd.f32 %v4577_v37, %v568_v18  ;;  %v3202_v33 = vadd.f32 %v4581_v22, %v3034_v28  ;;  %v3205_v1 = vadd.f32 %v4583_v26, %v580_v23  ;;  %v1296_v5 = vmul.f32 2.0, %v3158_v8  ;;  %v4586_v18 = vld [vmem:[#allocation78_spill] sm:$0xff] }
 0x17a   :  { %4562 = vst [vmem:[#allocation62_spill] sm:$0xff] %v3148_v29  ;;  %v1297_v11 = vmul.f32 2.0, %v3168_v10  ;;  %vm1163_vm4 = vcmp.lt.s32.totalorder %v3173_v13, 1  ;;  %v3215_v28 = vmul.f32 2.0, %v3175_v31  ;;  %v3217_v7 = vmul.f32 0.25, %v987_v54 }
 0x17b   :  { %4564 = vst [vmem:[#allocation65_spill] sm:$0xff] %v3152_v6  ;;  %vm1484_vm5 = vcmp.lt.s32.totalorder %v3173_v13, 7  ;;  %v3222_v37 = vmul.f32 2.0, %v3187_v49  ;;  %v3225_v22 = vmul.f32 0.25, %v988_v24  ;;  %vm73_vm6 = vcmp.ne.s32.totalorder %v3173_v13, 0 }
 0x17c   :  { %4565 = vst [vmem:[#allocation13_spill] sm:$0xff] %v3155_v27  ;;  %v801_v26 = vpop.permute.xlu2 %800  ;;  %v781_v62 = vpop.permute.xlu1 %780 }
 0x17d   :  { %4567 = vst [vmem:[#allocation95_spill] sm:$0xff] %v3166_v4  ;;  %v854_v42 = vsel %vm842_vm3, %v4585_v16, %v801_v26  ;;  %v886_v54 = vsel %vm842_vm3, %v801_v26, %v4585_v16  ;;  %v844_v23 = vsel %vm842_vm3, %v4586_v18, %v781_v62  ;;  %v876_v47 = vsel %vm842_vm3, %v781_v62, %v4586_v18  ;;  %v779_v24 = vpop.permute.xlu0 %778  ;;  %v4587_v26 = vld [vmem:[#allocation87_spill] sm:$0xff] }
 0x17e   :  { %4570 = vst [vmem:[#allocation33_spill] sm:$0xff] %v3178_v14  ;;  %v930_v40 = vmul.f32 %v2942_v35, %v886_v54  ;;  %v910_v4 = vmul.f32 %v2942_v35, %v876_v47  ;;  %v875_v18 = vsel %vm842_vm3, %v779_v24, %v4587_v26  ;;  %v3262_v52 = vmul.f32 2.0, %v3225_v22  ;;  %v4588_v47 = vld [vmem:[#allocation44_spill] sm:$0xff] }
 0x17f   :  { %4572 = vst [vmem:[#allocation72_spill] sm:$0xff] %v3181_v0  ;;  %v908_v16 = vmul.f32 %v2942_v35, %v875_v18 }
 0x180   :  { %4574 = vst [vmem:[#allocation67_spill] sm:$0xff] %v3185_v43  ;;  %v994_v62 = vadd.f32 %v930_v40, %v2886_v51 }
 0x181   :  { %4576 = vst [vmem:[#allocation66_spill] sm:$0xff] %v3191_v50  ;;  %v972_v43 = vadd.f32 %v908_v16, %v4588_v47  ;;  %v4591_v16 = vrot.slane %v3168_v10, 7 }
 0x182   :  { %4578 = vst [vmem:[#allocation69_spill] sm:$0xff] %v3194_v61  ;;  %v3265_v51 = vmul.f32 0.25, %v994_v62  ;;  %v4589_v62 = vrot.slane %v3158_v8, 7 }
 0x183   :  { %4580 = vst [vmem:[#allocation17_spill] sm:$0xff] %v3198_v38  ;;  %v843_v38 = vsel %vm842_vm3, %v4587_v26, %v779_v24  ;;  %v4590_v24 = vrot.slane %v3158_v8, 1 }
 0x184   :  { %4582 = vst [vmem:[#allocation38_spill] sm:$0xff] %v3202_v33  ;;  %v973_v33 = vadd.f32 %v844_v23, %v2817_v55  ;;  %v3257_v23 = vmul.f32 2.0, %v3217_v7  ;;  %v971_v40 = vadd.f32 %v843_v38, %v2740_v39  ;;  %v805_v61 = vpop.permute.xlu2 %804  ;;  %v3308_v50 = vmul.f32 2.0, %v3265_v51 }
 0x185   :  { %4584 = vst [vmem:[#allocation76_spill] sm:$0xff] %v3205_v1  ;;  %v993_v1 = vadd.f32 %v854_v42, %v2919_v60  ;;  %v974_v60 = vadd.f32 %v910_v4, %v2789_v59 }
 0x186   :  { %v1037_v42 = vmul.f32 0.25, %v973_v33  ;;  %v3284_v55 = vmul.f32 0.25, %v971_v40 }
 0x187   :  { %v3252_v54 = vmul.f32 0.25, %v993_v1  ;;  %v1038_v4 = vmul.f32 0.25, %v974_v60 }
 0x188   :  { %v1101_v33 = vrot.slane %v1037_v42, 7  ;;  %v1422_v1 = vrot.slane %v1037_v42, 1  ;;  %v1294_v18 = vmul.f32 2.0, %v1037_v42  ;;  %v3286_v42 = vmul.f32 0.25, %v972_v43  ;;  %v787_v43 = vpop.permute.xlu1 %786 }
 0x189   :  { %v3270_v26 = vmul.f32 2.0, %v3252_v54  ;;  %v1102_v6 = vrot.slane %v1038_v4, 7  ;;  %v1295_v38 = vmul.f32 2.0, %v1038_v4  ;;  %v1423_v59 = vrot.slane %v1038_v4, 1  ;;  %v4593_v4 = vld [vmem:[#allocation89_spill] sm:$0xff] }
 0x18a   :  { %v1222_v39 = vsel %vm1163_vm4, %v1101_v33, %v4589_v62  ;;  %v1543_v0 = vsel %vm1484_vm5, %v1422_v1, %v4590_v24  ;;  %v4592_v62 = vrot.slane %v3168_v10, 1  ;;  %v888_v24 = vsel %vm842_vm3, %v805_v61, %v4593_v4 }
 0x18b   :  { %v3278_v60 = vadd.f32 %v1296_v5, %v1222_v39  ;;  %v1223_v47 = vsel %vm1163_vm4, %v1102_v6, %v4591_v16  ;;  %v856_v39 = vsel %vm842_vm3, %v4593_v4, %v805_v61  ;;  %v4311_v16 = vrot.slane %v3284_v55, 7  ;;  %v4594_v4 = vld [vmem:[#allocation81_spill] sm:$0xff] }
 0x18c   :  { %v1544_v5 = vsel %vm1484_vm5, %v1423_v59, %v4592_v62  ;;  %v3303_v12 = vadd.f32 %v1297_v11, %v1223_v47  ;;  %v4312_v19 = vrot.slane %v3286_v42, 7  ;;  %v934_v29 = vmul.f32 %v2942_v35, %v888_v24 }
 0x18d   :  { %v1224_v61 = vsel %vm1163_vm4, %v4311_v16, %v1101_v33  ;;  %v997_v47 = vadd.f32 %v856_v39, %v2983_v9  ;;  %v847_v40 = vsel %vm842_vm3, %v4594_v4, %v787_v43  ;;  %v4595_v27 = vrot.slane %v3284_v55, 1  ;;  %v785_v16 = vpop.permute.xlu0 %784 }
 0x18e   :  { %v1225_v11 = vsel %vm1163_vm4, %v4312_v19, %v1102_v6  ;;  %v1358_v62 = vadd.f32 %v1294_v18, %v1224_v61  ;;  %v998_v14 = vadd.f32 %v934_v29, %v2949_v32  ;;  %v879_v9 = vsel %vm842_vm3, %v787_v43, %v4594_v4  ;;  %v4599_v43 = vld [vmem:[#allocation90_spill] sm:$0xff] }
 0x18f   :  { %v1359_v24 = vadd.f32 %v1295_v38, %v1225_v11  ;;  %v3330_v33 = vsel %vm1484_vm5, %v4595_v27, %v1422_v1  ;;  %v3333_v6 = vmul.f32 0.25, %v997_v47  ;;  %v979_v39 = vadd.f32 %v847_v40, %v2860_v53  ;;  %v811_v47 = vpop.permute.xlu2 %810 }
 0x190   :  { %v3340_v18 = vmul.f32 2.0, %v3284_v55  ;;  %v1615_v38 = vadd.f32 %v1543_v0, %v1358_v62  ;;  %v916_v11 = vmul.f32 %v2942_v35, %v879_v9  ;;  %v3344_v27 = vmul.f32 2.0, %v3286_v42 }
 0x191   :  { %v1616_v61 = vadd.f32 %v1544_v5, %v1359_v24  ;;  %v4597_v32 = vrot.slane %v3286_v42, 1  ;;  %v3352_v1 = vmul.f32 0.25, %v998_v14  ;;  %v846_v53 = vsel %vm842_vm3, %v4599_v43, %v785_v16 }
 0x192   :  { %4596 = vst [vmem:[#allocation91_spill] sm:$0xff] %v3344_v27  ;;  %v1679_v40 = vmul.f32 0.25, %v1615_v38  ;;  %v980_v5 = vadd.f32 %v916_v11, %v2834_v63  ;;  %v1043_v62 = vmul.f32 0.25, %v979_v39  ;;  %v3360_v24 = vmul.f32 2.0, %v3333_v6  ;;  %v4601_v11 = vld [vmem:[#allocation92_spill] sm:$0xff] }
 0x193   :  { %v3350_v29 = vsel %vm1484_vm5, %v4597_v32, %v1423_v59  ;;  %v1680_v0 = vmul.f32 0.25, %v1616_v61  ;;  %v878_v14 = vsel %vm842_vm3, %v785_v16, %v4599_v43  ;;  %v977_v39 = vadd.f32 %v846_v53, %v2754_v20 }
 0x194   :  { %4598 = vst [vmem:[#allocation20_spill] sm:$0xff] %v3350_v29  ;;  %v1044_v38 = vmul.f32 0.25, %v980_v5  ;;  %v1107_v61 = vrot.slane %v1043_v62, 7  ;;  %v1428_v32 = vrot.slane %v1043_v62, 1  ;;  %v914_v63 = vmul.f32 %v2942_v35, %v878_v14 }
 0x195   :  { %4600 = vst [vmem:[#allocation73_spill] sm:$0xff] %v3360_v24  ;;  %v859_v19 = vsel %vm842_vm3, %v4601_v11, %v811_v47  ;;  %v891_v59 = vsel %vm842_vm3, %v811_v47, %v4601_v11  ;;  %v4602_v43 = vrot.slane %v3175_v31, 7  ;;  %v1300_v5 = vmul.f32 2.0, %v1043_v62 }
 0x196   :  { %1743 = vst [vmem:[#allocation5 + $0x10] sm:$0xff] %v1679_v40  ;;  %v1108_v16 = vrot.slane %v1044_v38, 7  ;;  %v4603_v20 = vrot.slane %v3175_v31, 1  ;;  %v978_v9 = vadd.f32 %v914_v63, %v2730_v48  ;;  %v1041_v4 = vmul.f32 0.25, %v977_v39 }
 0x197   :  { %1744 = vst [vmem:[#allocation5 + $0x18] sm:$0xff] %v1680_v0  ;;  %v1216_v40 = vsel %vm1163_vm4, %v1107_v61, %v4602_v43  ;;  %v1429_v0 = vrot.slane %v1044_v38, 1  ;;  %v4604_v47 = vrot.slane %v3187_v49, 7  ;;  %v4605_v43 = vrot.slane %v3187_v49, 1 }
 0x198   :  { %v3380_v14 = vadd.f32 %v3215_v28, %v1216_v40  ;;  %v1537_v53 = vsel %vm1484_vm5, %v1428_v32, %v4603_v20  ;;  %v940_v28 = vmul.f32 %v2942_v35, %v891_v59  ;;  %v1003_v40 = vadd.f32 %v859_v19, %v3015_v45 }
 0x199   :  { %v1217_v11 = vsel %vm1163_vm4, %v1108_v16, %v4604_v47  ;;  %v1538_v62 = vsel %vm1484_vm5, %v1429_v0, %v4605_v43  ;;  %v1042_v20 = vmul.f32 0.25, %v978_v9  ;;  %v1105_v48 = vrot.slane %v1041_v4, 7 }
 0x19a   :  { %v3398_v25 = vadd.f32 %v3222_v37, %v1217_v11  ;;  %v1298_v63 = vmul.f32 2.0, %v1041_v4  ;;  %v1301_v39 = vmul.f32 2.0, %v1044_v38  ;;  %v1426_v29 = vrot.slane %v1041_v4, 1 }
 0x19b   :  { %v1004_v27 = vadd.f32 %v940_v28, %v3008_v21  ;;  %v3401_v47 = vmul.f32 0.25, %v1003_v40  ;;  %v1106_v24 = vrot.slane %v1042_v20, 7  ;;  %v1218_v43 = vsel %vm1163_vm4, %v1105_v48, %v1107_v61 }
 0x19c   :  { %v4606_v59 = vrot.slane %v3158_v8, 7  ;;  %v1299_v19 = vmul.f32 2.0, %v1042_v20  ;;  %v1364_v9 = vadd.f32 %v1300_v5, %v1218_v43  ;;  %v1427_v11 = vrot.slane %v1042_v20, 1  ;;  %v793_v5 = vpop.permute.xlu1 %792 }
 0x19d   :  { %v1539_v4 = vsel %vm1484_vm5, %v1426_v29, %v1428_v32  ;;  %v1219_v21 = vsel %vm1163_vm4, %v1106_v24, %v1108_v16  ;;  %v4607_v38 = vrot.slane %v3168_v10, 7  ;;  %v4608_v28 = vrot.slane %v3158_v8, 1 }
 0x19e   :  { %v1220_v45 = vsel %vm1163_vm4, %v4606_v59, %v1105_v48  ;;  %v3421_v48 = vmul.f32 0.25, %v1004_v27  ;;  %v1540_v32 = vsel %vm1484_vm5, %v1427_v11, %v1429_v0  ;;  %v4609_v16 = vrot.slane %v3168_v10, 1 }
 0x19f   :  { %v1362_v37 = vadd.f32 %v1298_v63, %v1220_v45  ;;  %v1221_v61 = vsel %vm1163_vm4, %v4607_v38, %v1106_v24  ;;  %v1541_v40 = vsel %vm1484_vm5, %v4608_v28, %v1426_v29  ;;  %v1365_v63 = vadd.f32 %v1301_v39, %v1219_v21  ;;  %v4610_v39 = vld [vmem:[#allocation84_spill] sm:$0xff] }
 0x1a0   :  { %v1363_v20 = vadd.f32 %v1299_v19, %v1221_v61  ;;  %v1542_v43 = vsel %vm1484_vm5, %v4609_v16, %v1427_v11  ;;  %v1617_v24 = vadd.f32 %v1541_v40, %v3278_v60  ;;  %v1621_v45 = vadd.f32 %v1537_v53, %v1364_v9  ;;  %v791_v61 = vpop.permute.xlu0 %790  ;;  %v817_v60 = vpop.permute.xlu2 %816 }
 0x1a1   :  { %v1618_v8 = vadd.f32 %v1542_v43, %v3303_v12  ;;  %v1619_v59 = vadd.f32 %v1539_v4, %v1362_v37  ;;  %v3432_v27 = vmul.f32 2.0, %v3352_v1  ;;  %v1622_v19 = vadd.f32 %v1538_v62, %v1365_v63  ;;  %v4611_v63 = vld [vmem:[#allocation93_spill] sm:$0xff] }
 0x1a2   :  { %v1620_v29 = vadd.f32 %v1540_v32, %v1363_v20  ;;  %v850_v0 = vsel %vm842_vm3, %v4610_v39, %v793_v5  ;;  %v1447_v10 = vrot.slane %v3352_v1, 1  ;;  %v1681_v21 = vmul.f32 0.25, %v1617_v24  ;;  %v4612_v43 = vld [vmem:[#allocation21_spill] sm:$0xff] }
 0x1a3   :  { %v1682_v38 = vmul.f32 0.25, %v1618_v8  ;;  %v1683_v11 = vmul.f32 0.25, %v1619_v59  ;;  %v1685_v12 = vmul.f32 0.25, %v1621_v45  ;;  %v1131_v53 = vrot.slane %v3401_v47, 7 }
 0x1a4   :  { %v1684_v28 = vmul.f32 0.25, %v1620_v29  ;;  %v1132_v37 = vrot.slane %v3421_v48, 7  ;;  %v1686_v9 = vmul.f32 0.25, %v1622_v19  ;;  %1745 = vst [vmem:[#allocation5 + $0x20] sm:$0xff] %v1681_v21  ;;  %v3441_v62 = vmul.f32 2.0, %v3401_v47 }
 0x1a5   :  { %v882_v4 = vsel %vm842_vm3, %v793_v5, %v4610_v39  ;;  %v985_v40 = vadd.f32 %v850_v0, %v2897_v2  ;;  %1746 = vst [vmem:[#allocation5 + $0x28] sm:$0xff] %v1682_v38  ;;  %v849_v32 = vsel %vm842_vm3, %v4611_v63, %v791_v61  ;;  %v881_v16 = vsel %vm842_vm3, %v791_v61, %v4611_v63 }
 0x1a6   :  { %v922_v20 = vmul.f32 %v2942_v35, %v882_v4  ;;  %v862_v24 = vsel %vm842_vm3, %v4612_v43, %v817_v60  ;;  %1747 = vst [vmem:[#allocation5 + $0x30] sm:$0xff] %v1683_v11  ;;  %v920_v5 = vmul.f32 %v2942_v35, %v881_v16  ;;  %v983_v2 = vadd.f32 %v849_v32, %v2757_v46 }
 0x1a7   :  { %v1049_v8 = vmul.f32 0.25, %v985_v40  ;;  %v894_v59 = vsel %vm842_vm3, %v817_v60, %v4612_v43  ;;  %1748 = vst [vmem:[#allocation5 + $0x38] sm:$0xff] %v1684_v28  ;;  %v3463_v45 = vmul.f32 2.0, %v3421_v48  ;;  %v1009_v39 = vadd.f32 %v862_v24, %v3058_v15 }
 0x1a8   :  { %v986_v29 = vadd.f32 %v922_v20, %v2875_v58  ;;  %v946_v19 = vmul.f32 %v2942_v35, %v894_v59  ;;  %1749 = vst [vmem:[#allocation5 + $0x40] sm:$0xff] %v1685_v12  ;;  %v1452_v0 = vrot.slane %v3401_v47, 1  ;;  %v984_v46 = vadd.f32 %v920_v5, %v2743_v36 }
 0x1a9   :  { %v1113_v21 = vrot.slane %v1049_v8, 7  ;;  %v1434_v38 = vrot.slane %v1049_v8, 1  ;;  %1750 = vst [vmem:[#allocation5 + $0x48] sm:$0xff] %v1686_v9  ;;  %v1306_v61 = vmul.f32 2.0, %v1049_v8  ;;  %v1047_v60 = vmul.f32 0.25, %v983_v2 }
 0x1aa   :  { %v1050_v11 = vmul.f32 0.25, %v986_v29  ;;  %v1010_v28 = vadd.f32 %v946_v19, %v3049_v17  ;;  %v4613_v4 = vrot.slane %v3217_v7, 7  ;;  %v4614_v15 = vrot.slane %v3217_v7, 1 }
 0x1ab   :  { %v1048_v40 = vmul.f32 0.25, %v984_v46  ;;  %v3479_v20 = vmul.f32 0.25, %v1009_v39  ;;  %v1111_v17 = vrot.slane %v1047_v60, 7  ;;  %v1304_v43 = vmul.f32 2.0, %v1047_v60 }
 0x1ac   :  { %v1210_v58 = vsel %vm1163_vm4, %v1113_v21, %v4613_v4  ;;  %v1531_v12 = vsel %vm1484_vm5, %v1434_v38, %v4614_v15  ;;  %v1114_v36 = vrot.slane %v1050_v11, 7  ;;  %v1307_v9 = vmul.f32 2.0, %v1050_v11 }
 0x1ad   :  { %v3482_v63 = vadd.f32 %v3257_v23, %v1210_v58  ;;  %v1435_v32 = vrot.slane %v1050_v11, 1  ;;  %v1112_v16 = vrot.slane %v1048_v40, 7  ;;  %v1305_v24 = vmul.f32 2.0, %v1048_v40 }
 0x1ae   :  { %v4615_v8 = vrot.slane %v3225_v22, 7  ;;  %v4616_v2 = vrot.slane %v3225_v22, 1  ;;  %v1432_v29 = vrot.slane %v1047_v60, 1  ;;  %v1433_v19 = vrot.slane %v1048_v40, 1 }
 0x1af   :  { %v1212_v39 = vsel %vm1163_vm4, %v1111_v17, %v1113_v21  ;;  %v1213_v46 = vsel %vm1163_vm4, %v1112_v16, %v1114_v36  ;;  %v4617_v11 = vrot.slane %v3175_v31, 7  ;;  %v4618_v58 = vrot.slane %v3187_v49, 7 }
 0x1b0   :  { %v1211_v5 = vsel %vm1163_vm4, %v1114_v36, %v4615_v8  ;;  %v1532_v59 = vsel %vm1484_vm5, %v1435_v32, %v4616_v2  ;;  %v1370_v40 = vadd.f32 %v1306_v61, %v1212_v39  ;;  %v1533_v21 = vsel %vm1484_vm5, %v1432_v29, %v1434_v38  ;;  %v799_v2 = vpop.permute.xlu1 %798 }
 0x1b1   :  { %v3493_v23 = vadd.f32 %v3262_v52, %v1211_v5  ;;  %v1214_v4 = vsel %vm1163_vm4, %v4617_v11, %v1111_v17  ;;  %v1215_v60 = vsel %vm1163_vm4, %v4618_v58, %v1112_v16  ;;  %v1371_v52 = vadd.f32 %v1307_v9, %v1213_v46 }
 0x1b2   :  { %v1368_v15 = vadd.f32 %v1304_v43, %v1214_v4  ;;  %v1369_v8 = vadd.f32 %v1305_v24, %v1215_v60  ;;  %v1534_v36 = vsel %vm1484_vm5, %v1433_v19, %v1435_v32  ;;  %v4619_v5 = vrot.slane %v3175_v31, 1  ;;  %v4621_v4 = vld [vmem:[#allocation86_spill] sm:$0xff]  ;;  %v823_v60 = vpop.permute.xlu2 %822 }
 0x1b3   :  { %v4620_v11 = vrot.slane %v3187_v49, 1  ;;  %v1627_v43 = vadd.f32 %v1531_v12, %v1370_v40  ;;  %v1628_v39 = vadd.f32 %v1532_v59, %v1371_v52  ;;  %v3521_v32 = vmul.f32 0.25, %v1010_v28 }
 0x1b4   :  { %v1535_v17 = vsel %vm1484_vm5, %v4619_v5, %v1432_v29  ;;  %v1625_v9 = vadd.f32 %v1533_v21, %v1368_v15  ;;  %v1626_v24 = vadd.f32 %v1534_v36, %v1369_v8  ;;  %v853_v29 = vsel %vm842_vm3, %v4621_v4, %v799_v2  ;;  %v4622_v21 = vld [vmem:[#allocation16_spill] sm:$0xff] }
 0x1b5   :  { %v1536_v16 = vsel %vm1484_vm5, %v4620_v11, %v1433_v19  ;;  %v1623_v61 = vadd.f32 %v1535_v17, %v3380_v14  ;;  %v885_v49 = vsel %vm842_vm3, %v799_v2, %v4621_v4  ;;  %v797_v19 = vpop.permute.xlu0 %796  ;;  %v1692_v59 = vmul.f32 0.25, %v1628_v39  ;;  %v4623_v11 = vld [vmem:[#allocation96_spill] sm:$0xff] }
 0x1b6   :  { %v1624_v38 = vadd.f32 %v1536_v16, %v3398_v25  ;;  %v1689_v46 = vmul.f32 0.25, %v1625_v9  ;;  %v1690_v58 = vmul.f32 0.25, %v1626_v24  ;;  %v1691_v25 = vmul.f32 0.25, %v1627_v43  ;;  %v4624_v24 = vld [vmem:[#allocation51_spill] sm:$0xff] }
 0x1b7   :  { %v1687_v31 = vmul.f32 0.25, %v1623_v61  ;;  %v3533_v40 = vmul.f32 2.0, %v3479_v20  ;;  %v928_v52 = vmul.f32 %v2942_v35, %v885_v49  ;;  %v991_v8 = vadd.f32 %v853_v29, %v2931_v41  ;;  %1756 = vst [vmem:[#allocation5 + $0x78] sm:$0xff] %v1692_v59 }
 0x1b8   :  { %v1688_v12 = vmul.f32 0.25, %v1624_v38  ;;  %v852_v36 = vsel %vm842_vm3, %v4622_v21, %v797_v19  ;;  %v884_v5 = vsel %vm842_vm3, %v797_v19, %v4622_v21  ;;  %1753 = vst [vmem:[#allocation5 + $0x60] sm:$0xff] %v1689_v46  ;;  %v865_v16 = vsel %vm842_vm3, %v4623_v11, %v823_v60  ;;  %v841_v15 = vpop.permute.xlu1 %840 }
 0x1b9   :  { %1751 = vst [vmem:[#allocation5 + $0x50] sm:$0xff] %v1687_v31  ;;  %v926_v17 = vmul.f32 %v2942_v35, %v884_v5  ;;  %v989_v2 = vadd.f32 %v852_v36, %v2783_v34  ;;  %v897_v41 = vsel %vm842_vm3, %v823_v60, %v4623_v11  ;;  %v3552_v61 = vmul.f32 2.0, %v3521_v32 }
 0x1ba   :  { %1752 = vst [vmem:[#allocation5 + $0x58] sm:$0xff] %v1688_v12  ;;  %v992_v43 = vadd.f32 %v928_v52, %v2912_v44  ;;  %v1055_v38 = vmul.f32 0.25, %v991_v8  ;;  %v952_v31 = vmul.f32 %v2942_v35, %v897_v41  ;;  %v1015_v46 = vadd.f32 %v865_v16, %v3116_v3 }
 0x1bb   :  { %1754 = vst [vmem:[#allocation5 + $0x68] sm:$0xff] %v1690_v58  ;;  %v990_v34 = vadd.f32 %v926_v17, %v4624_v24  ;;  %v1053_v39 = vmul.f32 0.25, %v989_v2  ;;  %v4625_v44 = vrot.slane %v3252_v54, 7  ;;  %v4626_v3 = vrot.slane %v3252_v54, 1 }
 0x1bc   :  { %1755 = vst [vmem:[#allocation5 + $0x70] sm:$0xff] %v1691_v25  ;;  %v1056_v4 = vmul.f32 0.25, %v992_v43  ;;  %v1119_v29 = vrot.slane %v1055_v38, 7  ;;  %v1312_v49 = vmul.f32 2.0, %v1055_v38  ;;  %v1440_v19 = vrot.slane %v1055_v38, 1 }
 0x1bd   :  { %v1054_v12 = vmul.f32 0.25, %v990_v34  ;;  %v1117_v58 = vrot.slane %v1053_v39, 7  ;;  %v1310_v60 = vmul.f32 2.0, %v1053_v39  ;;  %v1438_v21 = vrot.slane %v1053_v39, 1 }
 0x1be   :  { %v1120_v36 = vrot.slane %v1056_v4, 7  ;;  %v1204_v25 = vsel %vm1163_vm4, %v1119_v29, %v4625_v44  ;;  %v1313_v52 = vmul.f32 2.0, %v1056_v4  ;;  %v1441_v8 = vrot.slane %v1056_v4, 1 }
 0x1bf   :  { %v3564_v5 = vadd.f32 %v3270_v26, %v1204_v25  ;;  %v1525_v59 = vsel %vm1484_vm5, %v1440_v19, %v4626_v3  ;;  %v1118_v17 = vrot.slane %v1054_v12, 7  ;;  %v1206_v2 = vsel %vm1163_vm4, %v1117_v58, %v1119_v29 }
 0x1c0   :  { %v4627_v11 = vrot.slane %v3265_v51, 7  ;;  %v4628_v41 = vrot.slane %v3265_v51, 1  ;;  %v4629_v43 = vrot.slane %v3217_v7, 7  ;;  %v1311_v24 = vmul.f32 2.0, %v1054_v12 }
 0x1c1   :  { %v1207_v39 = vsel %vm1163_vm4, %v1118_v17, %v1120_v36  ;;  %v4630_v4 = vrot.slane %v3225_v22, 7  ;;  %v1376_v3 = vadd.f32 %v1312_v49, %v1206_v2  ;;  %v4632_v49 = vrot.slane %v3225_v22, 1 }
 0x1c2   :  { %v1205_v16 = vsel %vm1163_vm4, %v1120_v36, %v4627_v11  ;;  %v1526_v26 = vsel %vm1484_vm5, %v1441_v8, %v4628_v41  ;;  %v1208_v38 = vsel %vm1163_vm4, %v4629_v43, %v1117_v58  ;;  %v1377_v11 = vadd.f32 %v1313_v52, %v1207_v39  ;;  %v803_v39 = vpop.permute.xlu0 %802 }
 0x1c3   :  { %v3585_v34 = vadd.f32 %v3308_v50, %v1205_v16  ;;  %v1209_v29 = vsel %vm1163_vm4, %v4630_v4, %v1118_v17  ;;  %v1374_v44 = vadd.f32 %v1310_v60, %v1208_v38  ;;  %v1439_v41 = vrot.slane %v1054_v12, 1 }
 0x1c4   :  { %v1375_v25 = vadd.f32 %v1311_v24, %v1209_v29  ;;  %v1527_v58 = vsel %vm1484_vm5, %v1438_v21, %v1440_v19  ;;  %v4631_v50 = vrot.slane %v3217_v7, 1  ;;  %v1016_v36 = vadd.f32 %v952_v31, %v3077_v56 }
 0x1c5   :  { %v3600_v43 = vmul.f32 0.25, %v1015_v46  ;;  %v1528_v60 = vsel %vm1484_vm5, %v1439_v41, %v1441_v8  ;;  %v1530_v12 = vsel %vm1484_vm5, %v4632_v49, %v1439_v41  ;;  %v1631_v19 = vadd.f32 %v1527_v58, %v1374_v44  ;;  %v4633_v41 = vld [vmem:[#allocation33_spill] sm:$0xff] }
 0x1c6   :  { %v1529_v16 = vsel %vm1484_vm5, %v4631_v50, %v1438_v21  ;;  %v1630_v7 = vadd.f32 %v1530_v12, %v3493_v23  ;;  %v1632_v17 = vadd.f32 %v1528_v60, %v1375_v25  ;;  %v1633_v2 = vadd.f32 %v1525_v59, %v1376_v3  ;;  %v829_v3 = vpop.permute.xlu2 %828  ;;  %v4634_v50 = vld [vmem:[#allocation97_spill] sm:$0xff]  ;;  %v4635_v12 = vld [vmem:[#allocation40_spill] sm:$0xff] }
 0x1c7   :  { %v1629_v52 = vadd.f32 %v1529_v16, %v3482_v63  ;;  %v1634_v21 = vadd.f32 %v1526_v26, %v1377_v11  ;;  %v1695_v56 = vmul.f32 0.25, %v1631_v19  ;;  %v3610_v31 = vmul.f32 0.25, %v1016_v36  ;;  %v4646_v36 = vld [vmem:[#allocation59_spill] sm:$0xff]  ;;  %v4650_v8 = vld [vmem:[#allocation73_spill] sm:$0xff] }
 0x1c8   :  { %v57_v46 = vadd.s32 248, %v3173_v13  ;;  %v1694_v22 = vmul.f32 0.25, %v1630_v7  ;;  %v1696_v24 = vmul.f32 0.25, %v1632_v17  ;;  %v1697_v63 = vmul.f32 0.25, %v1633_v2  ;;  %v3649_v2 = vpop.permute.xlu1 %808 }
 0x1c9   :  { %v1693_v38 = vmul.f32 0.25, %v1629_v52  ;;  %v1698_v4 = vmul.f32 0.25, %v1634_v21  ;;  %v3618_v26 = vmul.f32 2.0, %v3600_v43  ;;  %v3621_v29 = vmul.f32 2.0, %v3610_v31  ;;  %1759 = vst [vmem:[#allocation5 + $0x90] sm:$0xff] %v1695_v56 }
 0x1ca   :  { %1758 = vst [vmem:[#allocation5 + $0x88] sm:$0xff] %v1694_v22  ;;  %v874_v25 = vsel %vm842_vm3, %v2851_v30, %v841_v15  ;;  %vm200_vm7 = vcmp.ne.s32.totalorder %v57_v46, 255  ;;  %v906_v11 = vsel %vm842_vm3, %v841_v15, %v2851_v30  ;;  %v855_v16 = vsel %vm842_vm3, %v4634_v50, %v803_v39  ;;  %v4636_v15 = vld [vmem:[#allocation31_spill] sm:$0xff]  ;;  %v4638_v22 = vld [vmem:[#allocation13_spill] sm:$0xff] }
 0x1cb   :  { %1757 = vst [vmem:[#allocation5 + $0x80] sm:$0xff] %v1693_v38  ;;  %v1033_v58 = vadd.f32 %v874_v25, %v4633_v41  ;;  %v970_v60 = vmul.f32 %v2942_v35, %v906_v11  ;;  %v887_v49 = vsel %vm842_vm3, %v803_v39, %v4634_v50  ;;  %v995_v52 = vadd.f32 %v855_v16, %v4635_v12  ;;  %v4639_v11 = vld [vmem:[#allocation35_spill] sm:$0xff]  ;;  %v4640_v50 = vld [vmem:[#allocation62_spill] sm:$0xff]  ;;  %v4641_v46 = vld [vmem:[#allocation25_spill] sm:$0xff] }
 0x1cc   :  { %1760 = vst [vmem:[#allocation5 + $0x98] sm:$0xff] %v1696_v24  ;;  %v932_v30 = vmul.f32 %v2942_v35, %v887_v49  ;;  %v868_v7 = vsel %vm842_vm3, %v4636_v15, %v829_v3  ;;  %v900_v17 = vsel %vm842_vm3, %v829_v3, %v4636_v15  ;;  %v4637_v21 = vmov 0.0  }
 0x1cd   :  { %1761 = vst [vmem:[#allocation5 + $0xa0] sm:$0xff] %v1697_v63  ;;  %v3640_v19 = vmul.f32 0.25, %v1033_v58  ;;  %v1826_v38 = vsel %vm73_vm6, 1.0, %v4637_v21  ;;  %v3656_v56 = vsel %vm200_vm7, 1.0, %v4637_v21  ;;  %v1034_v24 = vadd.f32 %v970_v60, %v4638_v22 }
 0x1ce   :  { %1762 = vst [vmem:[#allocation5 + $0xa8] sm:$0xff] %v1698_v4  ;;  %v1059_v39 = vmul.f32 0.25, %v995_v52  ;;  %v996_v3 = vadd.f32 %v932_v30, %v4639_v11  ;;  %v958_v41 = vmul.f32 %v2942_v35, %v900_v17  ;;  %v1021_v16 = vadd.f32 %v868_v7, %v4640_v50 }
 0x1cf   :  { %v4313_v63 = vrot.slane %v3640_v19, 7  ;;  %v4314_v25 = vrot.slane %v3640_v19, 1  ;;  %v3663_v4 = vmul.f32 0.25, %v1034_v24  ;;  %v858_v49 = vsel %vm842_vm3, %v4641_v46, %v3649_v2 }
 0x1d0   :  { %v1123_v58 = vrot.slane %v1059_v39, 7  ;;  %v4642_v60 = vrot.slane %v3284_v55, 7  ;;  %v3677_v52 = vmul.f32 2.0, %v3640_v19  ;;  %v4643_v30 = vrot.slane %v3284_v55, 1 }
 0x1d1   :  { %v1060_v7 = vmul.f32 0.25, %v996_v3  ;;  %v4315_v17 = vrot.slane %v3663_v4, 7  ;;  %v1316_v22 = vmul.f32 2.0, %v1059_v39  ;;  %v1444_v24 = vrot.slane %v1059_v39, 1 }
 0x1d2   :  { %v1226_v12 = vsel %vm1163_vm4, %v4313_v63, %v4642_v60  ;;  %v1547_v15 = vsel %vm1484_vm5, %v4314_v25, %v4643_v30  ;;  %v4644_v50 = vrot.slane %v3333_v6, 7  ;;  %v4645_v63 = vrot.slane %v3252_v54, 7 }
 0x1d3   :  { %v1228_v21 = vmul.f32 %v1826_v38, %v1226_v12  ;;  %v1124_v11 = vrot.slane %v1060_v7, 7  ;;  %v1022_v44 = vadd.f32 %v958_v41, %v4646_v36  ;;  %v4647_v3 = vrot.slane %v3286_v42, 7 }
 0x1d4   :  { %v1200_v60 = vsel %vm1163_vm4, %v1123_v58, %v4644_v50  ;;  %v1202_v55 = vsel %vm1163_vm4, %v4645_v63, %v1123_v58  ;;  %v3702_v12 = vmul.f32 2.0, %v3663_v4  ;;  %v1317_v50 = vmul.f32 2.0, %v1060_v7 }
 0x1d5   :  { %v1227_v39 = vsel %vm1163_vm4, %v4315_v17, %v4647_v3  ;;  %v1356_v30 = vadd.f32 %v3340_v18, %v1228_v21  ;;  %v4316_v59 = vrot.slane %v3663_v4, 1  ;;  %v4648_v63 = vrot.slane %v3352_v1, 7 }
 0x1d6   :  { %v1229_v25 = vmul.f32 %v1826_v38, %v1227_v39  ;;  %v4649_v41 = vrot.slane %v3265_v51, 7  ;;  %v1380_v17 = vadd.f32 %v1316_v22, %v1202_v55  ;;  %v3716_v18 = vadd.f32 %v4650_v8, %v1200_v60  ;;  %v4651_v38 = vld [vmem:[#allocation91_spill] sm:$0xff]  ;;  %v4654_v60 = vld [vmem:[#allocation20_spill] sm:$0xff] }
 0x1d7   :  { %v1201_v36 = vsel %vm1163_vm4, %v1124_v11, %v4648_v63  ;;  %v1613_v3 = vadd.f32 %v3330_v33, %v1356_v30  ;;  %v1445_v9 = vrot.slane %v1060_v7, 1  ;;  %v4652_v63 = vrot.slane %v3333_v6, 1 }
 0x1d8   :  { %v1203_v58 = vsel %vm1163_vm4, %v4649_v41, %v1124_v11  ;;  %v1357_v21 = vadd.f32 %v4651_v38, %v1229_v25  ;;  %v3720_v39 = vadd.f32 %v3432_v27, %v1201_v36  ;;  %v4653_v11 = vrot.slane %v3252_v54, 1  ;;  %v835_v36 = vpop.permute.xlu2 %834 }
 0x1d9   :  { %v1381_v23 = vadd.f32 %v1317_v50, %v1203_v58  ;;  %v1521_v28 = vsel %vm1484_vm5, %v1444_v24, %v4652_v63  ;;  %v1677_v14 = vmul.f32 0.25, %v1613_v3  ;;  %v3730_v8 = vmul.f32 0.25, %v1021_v16  ;;  %v4657_v3 = vld [vmem:[#allocation49_spill] sm:$0xff]  ;;  %v4658_v63 = vld [vmem:[#allocation24_spill] sm:$0xff] }
 0x1da   :  { %v1523_v33 = vsel %vm1484_vm5, %v4653_v11, %v1444_v24  ;;  %v1637_v22 = vadd.f32 %v1521_v28, %v1380_v17  ;;  %v1614_v25 = vadd.f32 %v4654_v60, %v1357_v21  ;;  %v1522_v27 = vsel %vm1484_vm5, %v1445_v9, %v1447_v10 }
 0x1db   :  { %v4655_v7 = vrot.slane %v3265_v51, 1  ;;  %v1635_v54 = vadd.f32 %v1523_v33, %v3564_v5  ;;  %1741 = vst [vmem:[#allocation5] sm:$0xff] %v1677_v14  ;;  %v1638_v28 = vadd.f32 %v1522_v27, %v1381_v23  ;;  %v3743_v17 = vmul.f32 0.25, %v1022_v44  ;;  %v807_v14 = vpop.permute.xlu0 %806 }
 0x1dc   :  { %v1701_v16 = vmul.f32 0.25, %v1637_v22  ;;  %v4656_v30 = vrot.slane %v3286_v42, 1  ;;  %v3754_v51 = vmul.f32 %v3656_v56, %v1547_v15  ;;  %v1149_v44 = vrot.slane %v3730_v8, 7  ;;  %v4659_v22 = vld [vmem:[#allocation47_spill] sm:$0xff] }
 0x1dd   :  { %v1524_v55 = vsel %vm1484_vm5, %v4655_v7, %v1445_v9  ;;  %v1678_v9 = vmul.f32 0.25, %v1614_v25  ;;  %v1699_v5 = vmul.f32 0.25, %v1635_v54  ;;  %v1702_v23 = vmul.f32 0.25, %v1638_v28  ;;  %v4662_v28 = vld [vmem:[#allocation66_spill] sm:$0xff] }
 0x1de   :  { %v1636_v24 = vadd.f32 %v1524_v55, %v3585_v34  ;;  %v3751_v50 = vsel %vm1484_vm5, %v4316_v59, %v4656_v30  ;;  %1765 = vst [vmem:[#allocation5 + $0xc0] sm:$0xff] %v1701_v16  ;;  %v3758_v42 = vmul.f32 2.0, %v3730_v8  ;;  %v3762_v58 = vmul.f32 2.0, %v3743_v17  ;;  %v4661_v55 = vld [vmem:[#allocation36_spill] sm:$0xff] }
 0x1df   :  { %1742 = vst [vmem:[#allocation5 + $0x8] sm:$0xff] %v1678_v9  ;;  %v890_v15 = vsel %vm842_vm3, %v3649_v2, %v4641_v46  ;;  %v1001_v38 = vadd.f32 %v858_v49, %v4657_v3  ;;  %v857_v11 = vsel %vm842_vm3, %v4658_v63, %v807_v14  ;;  %v889_v33 = vsel %vm842_vm3, %v807_v14, %v4658_v63  ;;  %v4660_v46 = vld [vmem:[#allocation55_spill] sm:$0xff]  ;;  %v4663_v14 = vld [vmem:[#allocation9_spill] sm:$0xff]  ;;  %v4664_v63 = vld [vmem:[#allocation28_spill] sm:$0xff] }
 0x1e0   :  { %v1700_v34 = vmul.f32 0.25, %v1636_v24  ;;  %1763 = vst [vmem:[#allocation5 + $0xb0] sm:$0xff] %v1699_v5  ;;  %v938_v21 = vmul.f32 %v2942_v35, %v890_v15  ;;  %v871_v60 = vsel %vm842_vm3, %v4659_v22, %v835_v36  ;;  %v936_v2 = vmul.f32 %v2942_v35, %v889_v33 }
 0x1e1   :  { %v1065_v25 = vmul.f32 0.25, %v1001_v38  ;;  %v999_v49 = vadd.f32 %v857_v11, %v4660_v46  ;;  %v903_v27 = vsel %vm842_vm3, %v835_v36, %v4659_v22  ;;  %1766 = vst [vmem:[#allocation5 + $0xc8] sm:$0xff] %v1702_v23  ;;  %v1027_v16 = vadd.f32 %v871_v60, %v4662_v28  ;;  %v815_v22 = vpop.permute.xlu1 %814 }
 0x1e2   :  { %1764 = vst [vmem:[#allocation5 + $0xb8] sm:$0xff] %v1700_v34  ;;  %v1002_v54 = vadd.f32 %v938_v21, %v4661_v55  ;;  %v964_v24 = vmul.f32 %v2942_v35, %v903_v27  ;;  %v1000_v34 = vadd.f32 %v936_v2, %v4663_v14  ;;  %v4666_v59 = vrot.slane %v3333_v6, 7 }
 0x1e3   :  { %v1129_v9 = vrot.slane %v1065_v25, 7  ;;  %v1450_v5 = vrot.slane %v1065_v25, 1  ;;  %v1322_v3 = vmul.f32 2.0, %v1065_v25  ;;  %v1063_v38 = vmul.f32 0.25, %v999_v49 }
 0x1e4   :  { %v1066_v15 = vmul.f32 0.25, %v1002_v54  ;;  %v1028_v36 = vadd.f32 %v964_v24, %v4664_v63  ;;  %v1064_v11 = vmul.f32 0.25, %v1000_v34  ;;  %v3799_v33 = vmul.f32 0.25, %v1027_v16  ;;  %v813_v24 = vpop.permute.xlu0 %812 }
 0x1e5   :  { %v1194_v23 = vsel %vm1163_vm4, %v1129_v9, %v1131_v53  ;;  %v1515_v21 = vsel %vm1484_vm5, %v1450_v5, %v1452_v0  ;;  %v1127_v49 = vrot.slane %v1063_v38, 7  ;;  %v1320_v55 = vmul.f32 2.0, %v1063_v38 }
 0x1e6   :  { %v1130_v60 = vrot.slane %v1066_v15, 7  ;;  %v1323_v2 = vmul.f32 2.0, %v1066_v15  ;;  %v3802_v25 = vadd.f32 %v3441_v62, %v1194_v23  ;;  %v1451_v46 = vrot.slane %v1066_v15, 1 }
 0x1e7   :  { %v1128_v27 = vrot.slane %v1064_v11, 7  ;;  %v1321_v54 = vmul.f32 2.0, %v1064_v11  ;;  %v4665_v16 = vrot.slane %v3421_v48, 1  ;;  %v1448_v34 = vrot.slane %v1063_v38, 1 }
 0x1e8   :  { %v1195_v28 = vsel %vm1163_vm4, %v1130_v60, %v1132_v37  ;;  %v1449_v63 = vrot.slane %v1064_v11, 1  ;;  %v1196_v15 = vsel %vm1163_vm4, %v1127_v49, %v1129_v9  ;;  %v1198_v30 = vsel %vm1163_vm4, %v4666_v59, %v1127_v49 }
 0x1e9   :  { %v1516_v14 = vsel %vm1484_vm5, %v1451_v46, %v4665_v16  ;;  %v3813_v62 = vadd.f32 %v3463_v45, %v1195_v28  ;;  %v1197_v23 = vsel %vm1163_vm4, %v1128_v27, %v1130_v60  ;;  %v4667_v7 = vrot.slane %v3352_v1, 7 }
 0x1ea   :  { %v1384_v11 = vadd.f32 %v1320_v55, %v1198_v30  ;;  %v1386_v16 = vadd.f32 %v1322_v3, %v1196_v15  ;;  %v1387_v45 = vadd.f32 %v1323_v2, %v1197_v23  ;;  %v1517_v9 = vsel %vm1484_vm5, %v1448_v34, %v1450_v5 }
 0x1eb   :  { %v1199_v38 = vsel %vm1163_vm4, %v4667_v7, %v1128_v27  ;;  %v1518_v60 = vsel %vm1484_vm5, %v1449_v63, %v1451_v46  ;;  %v4668_v41 = vrot.slane %v3333_v6, 1  ;;  %v1520_v7 = vsel %vm1484_vm5, %v1447_v10, %v1449_v63 }
 0x1ec   :  { %v1385_v28 = vadd.f32 %v1321_v54, %v1199_v38  ;;  %v1641_v3 = vadd.f32 %v1517_v9, %v1384_v11  ;;  %v1643_v2 = vadd.f32 %v1515_v21, %v1386_v16  ;;  %v1640_v49 = vadd.f32 %v1520_v7, %v3720_v39  ;;  %v4669_v54 = vld [vmem:[#allocation12_spill] sm:$0xff]  ;;  %v821_v39 = vpop.permute.xlu1 %820  ;;  %v4671_v11 = vld [vmem:[#allocation34_spill] sm:$0xff] }
 0x1ed   :  { %v1519_v59 = vsel %vm1484_vm5, %v4668_v41, %v1448_v34  ;;  %v1644_v27 = vadd.f32 %v1516_v14, %v1387_v45  ;;  %v3841_v55 = vmul.f32 0.25, %v1028_v36  ;;  %v861_v41 = vsel %vm842_vm3, %v4669_v54, %v815_v22  ;;  %v4673_v7 = vld [vmem:[#allocation50_spill] sm:$0xff] }
 0x1ee   :  { %v1639_v30 = vadd.f32 %v1519_v59, %v3716_v18  ;;  %v1642_v5 = vadd.f32 %v1518_v60, %v1385_v28  ;;  %v1705_v6 = vmul.f32 0.25, %v1641_v3  ;;  %v893_v1 = vsel %vm842_vm3, %v815_v22, %v4669_v54  ;;  %v4670_v22 = vld [vmem:[#allocation57_spill] sm:$0xff]  ;;  %v3865_v28 = vpop.permute.xlu0 %818  ;;  %v4672_v60 = vld [vmem:[#allocation63_spill] sm:$0xff] }
 0x1ef   :  { %v1704_v10 = vmul.f32 0.25, %v1640_v49  ;;  %v1707_v34 = vmul.f32 0.25, %v1643_v2  ;;  %v1708_v63 = vmul.f32 0.25, %v1644_v27  ;;  %v3852_v14 = vmul.f32 2.0, %v3799_v33  ;;  %v4674_v49 = vld [vmem:[#allocation14_spill] sm:$0xff] }
 0x1f0   :  { %v1703_v46 = vmul.f32 0.25, %v1639_v30  ;;  %v1706_v18 = vmul.f32 0.25, %v1642_v5  ;;  %v3855_v15 = vmul.f32 2.0, %v3841_v55  ;;  %v944_v23 = vmul.f32 %v2942_v35, %v893_v1  ;;  %1769 = vst [vmem:[#allocation5 + $0xe0] sm:$0xff] %v1705_v6 }
 0x1f1   :  { %1768 = vst [vmem:[#allocation5 + $0xd8] sm:$0xff] %v1704_v10  ;;  %v1007_v38 = vadd.f32 %v861_v41, %v4670_v22  ;;  %v860_v16 = vsel %vm842_vm3, %v4671_v11, %v813_v24  ;;  %v892_v45 = vsel %vm842_vm3, %v813_v24, %v4671_v11  ;;  %v864_v30 = vsel %vm842_vm3, %v4673_v7, %v821_v39  ;;  %v4676_v41 = vld [vmem:[#allocation23_spill] sm:$0xff] }
 0x1f2   :  { %1767 = vst [vmem:[#allocation5 + $0xd0] sm:$0xff] %v1703_v46  ;;  %v942_v9 = vmul.f32 %v2942_v35, %v892_v45  ;;  %v1005_v59 = vadd.f32 %v860_v16, %v4672_v60  ;;  %v896_v3 = vsel %vm842_vm3, %v821_v39, %v4673_v7  ;;  %v1008_v24 = vadd.f32 %v944_v23, %v4674_v49  ;;  %v4675_v46 = vld [vmem:[#allocation52_spill] sm:$0xff]  ;;  %v4677_v10 = vld [vmem:[#allocation43_spill] sm:$0xff] }
 0x1f3   :  { %1770 = vst [vmem:[#allocation5 + $0xe8] sm:$0xff] %v1706_v18  ;;  %v1071_v5 = vmul.f32 0.25, %v1007_v38  ;;  %v950_v27 = vmul.f32 %v2942_v35, %v896_v3  ;;  %v1013_v1 = vadd.f32 %v864_v30, %v4676_v41  ;;  %v895_v22 = vsel %vm842_vm3, %v3865_v28, %v4677_v10 }
 0x1f4   :  { %1771 = vst [vmem:[#allocation5 + $0xf0] sm:$0xff] %v1707_v34  ;;  %v1006_v6 = vadd.f32 %v942_v9, %v4675_v46  ;;  %v1069_v54 = vmul.f32 0.25, %v1005_v59  ;;  %v1072_v18 = vmul.f32 0.25, %v1008_v24  ;;  %v4678_v9 = vrot.slane %v3479_v20, 7 }
 0x1f5   :  { %1772 = vst [vmem:[#allocation5 + $0xf8] sm:$0xff] %v1708_v63  ;;  %v1135_v39 = vrot.slane %v1071_v5, 7  ;;  %v1328_v11 = vmul.f32 2.0, %v1071_v5  ;;  %v1456_v16 = vrot.slane %v1071_v5, 1  ;;  %v4679_v63 = vrot.slane %v3479_v20, 1 }
 0x1f6   :  { %v1070_v23 = vmul.f32 0.25, %v1006_v6  ;;  %v1133_v38 = vrot.slane %v1069_v54, 7  ;;  %v1326_v45 = vmul.f32 2.0, %v1069_v54  ;;  %v1454_v60 = vrot.slane %v1069_v54, 1 }
 0x1f7   :  { %v1136_v34 = vrot.slane %v1072_v18, 7  ;;  %v1188_v59 = vsel %vm1163_vm4, %v1135_v39, %v4678_v9  ;;  %v1329_v7 = vmul.f32 2.0, %v1072_v18  ;;  %v1457_v30 = vrot.slane %v1072_v18, 1 }
 0x1f8   :  { %v3889_v3 = vadd.f32 %v3533_v40, %v1188_v59  ;;  %v1509_v49 = vsel %vm1484_vm5, %v1456_v16, %v4679_v63  ;;  %v1134_v24 = vrot.slane %v1070_v23, 7  ;;  %v1190_v5 = vsel %vm1163_vm4, %v1133_v38, %v1135_v39 }
 0x1f9   :  { %v4680_v46 = vrot.slane %v3521_v32, 7  ;;  %v4681_v54 = vrot.slane %v3521_v32, 1  ;;  %v1192_v41 = vsel %vm1163_vm4, %v1131_v53, %v1133_v38  ;;  %v1327_v18 = vmul.f32 2.0, %v1070_v23  ;;  %v4682_v38 = vld [vmem:[#allocation46_spill] sm:$0xff] }
 0x1fa   :  { %v1191_v39 = vsel %vm1163_vm4, %v1134_v24, %v1136_v34  ;;  %v1193_v59 = vsel %vm1163_vm4, %v1132_v37, %v1134_v24  ;;  %v1390_v63 = vadd.f32 %v1326_v45, %v1192_v41  ;;  %v1455_v36 = vrot.slane %v1070_v23, 1 }
 0x1fb   :  { %v1189_v6 = vsel %vm1163_vm4, %v1136_v34, %v4680_v46  ;;  %v1510_v40 = vsel %vm1484_vm5, %v1457_v30, %v4681_v54  ;;  %v1391_v46 = vadd.f32 %v1327_v18, %v1193_v59  ;;  %v1392_v54 = vadd.f32 %v1328_v11, %v1190_v5 }
 0x1fc   :  { %v3910_v9 = vadd.f32 %v3552_v61, %v1189_v6  ;;  %v1393_v2 = vadd.f32 %v1329_v7, %v1191_v39  ;;  %v1511_v53 = vsel %vm1484_vm5, %v1454_v60, %v1456_v16  ;;  %v1513_v61 = vsel %vm1484_vm5, %v1452_v0, %v1454_v60 }
 0x1fd   :  { %v1014_v34 = vadd.f32 %v950_v27, %v4682_v38  ;;  %v1077_v6 = vmul.f32 0.25, %v1013_v1  ;;  %v1512_v21 = vsel %vm1484_vm5, %v1455_v36, %v1457_v30  ;;  %v4683_v37 = vrot.slane %v3421_v48, 1 }
 0x1fe   :  { %v1645_v23 = vadd.f32 %v1513_v61, %v3802_v25  ;;  %v1647_v45 = vadd.f32 %v1511_v53, %v1390_v63  ;;  %v1648_v47 = vadd.f32 %v1512_v21, %v1391_v46  ;;  %v1649_v7 = vadd.f32 %v1509_v49, %v1392_v54  ;;  %v825_v63 = vpop.permute.xlu0 %824  ;;  %v4686_v46 = vld [vmem:[#allocation72_spill] sm:$0xff] }
 0x1ff   :  { %v1514_v11 = vsel %vm1484_vm5, %v4683_v37, %v1455_v36  ;;  %v1650_v24 = vadd.f32 %v1510_v40, %v1393_v2  ;;  %v1078_v27 = vmul.f32 0.25, %v1014_v34  ;;  %v1141_v1 = vrot.slane %v1077_v6, 7  ;;  %v827_v36 = vpop.permute.xlu1 %826  ;;  %v4687_v53 = vld [vmem:[#allocation8_spill] sm:$0xff] }
 0x200   :  { %v1646_v16 = vadd.f32 %v1514_v11, %v3813_v62  ;;  %v1709_v0 = vmul.f32 0.25, %v1645_v23  ;;  %v1711_v60 = vmul.f32 0.25, %v1647_v45  ;;  %v1712_v41 = vmul.f32 0.25, %v1648_v47  ;;  %v4690_v11 = vld [vmem:[#allocation18_spill] sm:$0xff]  ;;  %v4691_v47 = vld [vmem:[#allocation65_spill] sm:$0xff] }
 0x201   :  { %v1713_v30 = vmul.f32 0.25, %v1649_v7  ;;  %v863_v48 = vsel %vm842_vm3, %v4677_v10, %v3865_v28  ;;  %v1714_v25 = vmul.f32 0.25, %v1650_v24  ;;  %v1142_v18 = vrot.slane %v1078_v27, 7 }
 0x202   :  { %v1710_v5 = vmul.f32 0.25, %v1646_v16  ;;  %1773 = vst [vmem:[#allocation5 + $0x100] sm:$0xff] %v1709_v0  ;;  %v4684_v62 = vrot.slane %v3600_v43, 7  ;;  %v1334_v2 = vmul.f32 2.0, %v1077_v6  ;;  %v1462_v40 = vrot.slane %v1077_v6, 1 }
 0x203   :  { %v1463_v39 = vrot.slane %v1078_v27, 1  ;;  %v948_v59 = vmul.f32 %v2942_v35, %v895_v22  ;;  %1775 = vst [vmem:[#allocation5 + $0x110] sm:$0xff] %v1711_v60  ;;  %v4685_v28 = vrot.slane %v3610_v31, 7  ;;  %v1011_v54 = vadd.f32 %v863_v48, %v4686_v46 }
 0x204   :  { %v1182_v21 = vsel %vm1163_vm4, %v1141_v1, %v4684_v62  ;;  %1774 = vst [vmem:[#allocation5 + $0x108] sm:$0xff] %v1710_v5  ;;  %v867_v61 = vsel %vm842_vm3, %v4687_v53, %v827_v36  ;;  %v4688_v38 = vrot.slane %v3600_v43, 1  ;;  %v4689_v6 = vrot.slane %v3610_v31, 1 }
 0x205   :  { %v3942_v49 = vadd.f32 %v3618_v26, %v1182_v21  ;;  %v1183_v10 = vsel %vm1163_vm4, %v1142_v18, %v4685_v28  ;;  %v899_v26 = vsel %vm842_vm3, %v827_v36, %v4687_v53  ;;  %1776 = vst [vmem:[#allocation5 + $0x118] sm:$0xff] %v1712_v41  ;;  %v1012_v23 = vadd.f32 %v948_v59, %v4690_v11  ;;  %v4693_v41 = vld [vmem:[#allocation69_spill] sm:$0xff]  ;;  %v4694_v21 = vld [vmem:[#allocation54_spill] sm:$0xff] }
 0x206   :  { %v3957_v22 = vadd.f32 %v3621_v29, %v1183_v10  ;;  %v1503_v34 = vsel %vm1484_vm5, %v1462_v40, %v4688_v38  ;;  %v1504_v37 = vsel %vm1484_vm5, %v1463_v39, %v4689_v6  ;;  %1777 = vst [vmem:[#allocation5 + $0x120] sm:$0xff] %v1713_v30  ;;  %v1075_v45 = vmul.f32 0.25, %v1011_v54  ;;  %v4692_v29 = vld [vmem:[#allocation53_spill] sm:$0xff] }
 0x207   :  { %v956_v16 = vmul.f32 %v2942_v35, %v899_v26  ;;  %v1019_v7 = vadd.f32 %v867_v61, %v4691_v47  ;;  %v866_v24 = vsel %vm842_vm3, %v4692_v29, %v825_v63  ;;  %1778 = vst [vmem:[#allocation5 + $0x128] sm:$0xff] %v1714_v25  ;;  %v1335_v0 = vmul.f32 2.0, %v1078_v27 }
 0x208   :  { %v1076_v60 = vmul.f32 0.25, %v1012_v23  ;;  %v898_v5 = vsel %vm842_vm3, %v825_v63, %v4692_v29  ;;  %v1017_v48 = vadd.f32 %v866_v24, %v4693_v41  ;;  %v1139_v36 = vrot.slane %v1075_v45, 7 }
 0x209   :  { %v1332_v30 = vmul.f32 2.0, %v1075_v45  ;;  %v1460_v62 = vrot.slane %v1075_v45, 1  ;;  %v1020_v59 = vadd.f32 %v956_v16, %v4694_v21  ;;  %v3978_v54 = vmul.f32 0.25, %v1019_v7  ;;  %v833_v7 = vpop.permute.xlu1 %832  ;;  %v4699_v21 = vld [vmem:[#allocation56_spill] sm:$0xff] }
 0x20a   :  { %v1140_v28 = vrot.slane %v1076_v60, 7  ;;  %v1333_v10 = vmul.f32 2.0, %v1076_v60  ;;  %v1461_v46 = vrot.slane %v1076_v60, 1  ;;  %v1184_v27 = vsel %vm1163_vm4, %v1139_v36, %v1141_v1 }
 0x20b   :  { %v4695_v25 = vrot.slane %v3479_v20, 7  ;;  %v1505_v53 = vsel %vm1484_vm5, %v1460_v62, %v1462_v40  ;;  %v4696_v61 = vrot.slane %v3479_v20, 1  ;;  %v4697_v6 = vrot.slane %v3521_v32, 7 }
 0x20c   :  { %v1185_v38 = vsel %vm1163_vm4, %v1140_v28, %v1142_v18  ;;  %v1398_v23 = vadd.f32 %v1334_v2, %v1184_v27  ;;  %v1506_v40 = vsel %vm1484_vm5, %v1461_v46, %v1463_v39  ;;  %v4698_v20 = vrot.slane %v3521_v32, 1 }
 0x20d   :  { %v1186_v63 = vsel %vm1163_vm4, %v4695_v25, %v1139_v36  ;;  %v1507_v26 = vsel %vm1484_vm5, %v4696_v61, %v1460_v62  ;;  %v1187_v1 = vsel %vm1163_vm4, %v4697_v6, %v1140_v28  ;;  %v1399_v16 = vadd.f32 %v1335_v0, %v1185_v38  ;;  %v4702_v6 = vld [vmem:[#allocation67_spill] sm:$0xff] }
 0x20e   :  { %v1396_v11 = vadd.f32 %v1332_v30, %v1186_v63  ;;  %v1397_v45 = vadd.f32 %v1333_v10, %v1187_v1  ;;  %v1508_v47 = vsel %vm1484_vm5, %v4698_v20, %v1461_v46  ;;  %v1651_v18 = vadd.f32 %v1507_v26, %v3889_v3 }
 0x20f   :  { %v1652_v29 = vadd.f32 %v1508_v47, %v3910_v9  ;;  %v1655_v60 = vadd.f32 %v1503_v34, %v1398_v23  ;;  %v1656_v36 = vadd.f32 %v1504_v37, %v1399_v16  ;;  %v1084_v2 = vmul.f32 0.25, %v1020_v59 }
 0x210   :  { %v1653_v24 = vadd.f32 %v1505_v53, %v1396_v11  ;;  %v1654_v41 = vadd.f32 %v1506_v40, %v1397_v45  ;;  %v1147_v0 = vrot.slane %v3978_v54, 7  ;;  %v1715_v30 = vmul.f32 0.25, %v1651_v18  ;;  %v831_v11 = vpop.permute.xlu0 %830 }
 0x211   :  { %v1716_v62 = vmul.f32 0.25, %v1652_v29  ;;  %v870_v32 = vsel %vm842_vm3, %v4699_v21, %v833_v7  ;;  %v1719_v10 = vmul.f32 0.25, %v1655_v60  ;;  %v1148_v46 = vrot.slane %v1084_v2, 7 }
 0x212   :  { %v1717_v39 = vmul.f32 0.25, %v1653_v24  ;;  %v1718_v28 = vmul.f32 0.25, %v1654_v41  ;;  %v1176_v3 = vsel %vm1163_vm4, %v1147_v0, %v1149_v44  ;;  %v1720_v9 = vmul.f32 0.25, %v1656_v36  ;;  %1779 = vst [vmem:[#allocation5 + $0x130] sm:$0xff] %v1715_v30  ;;  %v4706_v41 = vld [vmem:[#allocation11_spill] sm:$0xff] }
 0x213   :  { %v1340_v34 = vmul.f32 2.0, %v3978_v54  ;;  %v4016_v37 = vadd.f32 %v3758_v42, %v1176_v3  ;;  %v1468_v59 = vrot.slane %v3978_v54, 1  ;;  %1780 = vst [vmem:[#allocation5 + $0x138] sm:$0xff] %v1716_v62  ;;  %v4700_v27 = vrot.slane %v3743_v17, 7 }
 0x214   :  { %v1469_v63 = vrot.slane %v1084_v2, 1  ;;  %v954_v53 = vmul.f32 %v2942_v35, %v898_v5  ;;  %v1081_v61 = vmul.f32 0.25, %v1017_v48  ;;  %1781 = vst [vmem:[#allocation5 + $0x140] sm:$0xff] %v1717_v39  ;;  %v4701_v38 = vrot.slane %v3730_v8, 1 }
 0x215   :  { %v1177_v25 = vsel %vm1163_vm4, %v1148_v46, %v4700_v27  ;;  %v902_v54 = vsel %vm842_vm3, %v833_v7, %v4699_v21  ;;  %v1025_v1 = vadd.f32 %v870_v32, %v4702_v6  ;;  %1782 = vst [vmem:[#allocation5 + $0x148] sm:$0xff] %v1718_v28  ;;  %v4703_v5 = vrot.slane %v3743_v17, 1  ;;  %v4708_v27 = vld [vmem:[#allocation10_spill] sm:$0xff] }
 0x216   :  { %v4025_v26 = vadd.f32 %v3762_v58, %v1177_v25  ;;  %v1497_v42 = vsel %vm1484_vm5, %v1468_v59, %v4701_v38  ;;  %v4704_v58 = vld [vmem:[#allocation61_spill] sm:$0xff]  ;;  %v1145_v45 = vrot.slane %v1081_v61, 7  ;;  %v1338_v16 = vmul.f32 2.0, %v1081_v61  ;;  %1783 = vst [vmem:[#allocation5 + $0x150] sm:$0xff] %v1719_v10 }
 0x217   :  { %v1498_v48 = vsel %vm1484_vm5, %v1469_v63, %v4703_v5  ;;  %v1018_v23 = vadd.f32 %v954_v53, %v4704_v58  ;;  %v1341_v40 = vmul.f32 2.0, %v1084_v2  ;;  %v1466_v20 = vrot.slane %v1081_v61, 1  ;;  %1784 = vst [vmem:[#allocation5 + $0x158] sm:$0xff] %v1720_v9 }
 0x218   :  { %v962_v47 = vmul.f32 %v2942_v35, %v902_v54  ;;  %v4041_v18 = vmul.f32 0.25, %v1025_v1  ;;  %v1178_v29 = vsel %vm1163_vm4, %v1145_v45, %v1147_v0  ;;  %v4705_v24 = vrot.slane %v3600_v43, 7 }
 0x219   :  { %v1082_v7 = vmul.f32 0.25, %v1018_v23  ;;  %v901_v36 = vsel %vm842_vm3, %v831_v11, %v4706_v41  ;;  %v1404_v30 = vadd.f32 %v1340_v34, %v1178_v29  ;;  %v1499_v62 = vsel %vm1484_vm5, %v1466_v20, %v1468_v59 }
 0x21a   :  { %v1180_v60 = vsel %vm1163_vm4, %v4705_v24, %v1145_v45  ;;  %v4707_v39 = vrot.slane %v3600_v43, 1  ;;  %v1026_v25 = vadd.f32 %v962_v47, %v4708_v27  ;;  %v1153_v53 = vrot.slane %v4041_v18, 7 }
 0x21b   :  { %v1402_v2 = vadd.f32 %v1338_v16, %v1180_v60  ;;  %v1146_v0 = vrot.slane %v1082_v7, 7  ;;  %v1339_v32 = vmul.f32 2.0, %v1082_v7  ;;  %v1467_v28 = vrot.slane %v1082_v7, 1 }
 0x21c   :  { %v1501_v21 = vsel %vm1484_vm5, %v4707_v39, %v1466_v20  ;;  %v1661_v9 = vadd.f32 %v1497_v42, %v1404_v30  ;;  %v4709_v59 = vrot.slane %v3610_v31, 7  ;;  %v4710_v38 = vrot.slane %v3610_v31, 1  ;;  %v837_v30 = vpop.permute.xlu0 %836  ;;  %v4714_v39 = vld [vmem:[#allocation17_spill] sm:$0xff] }
 0x21d   :  { %v1657_v10 = vadd.f32 %v1501_v21, %v3942_v49  ;;  %v1659_v3 = vadd.f32 %v1499_v62, %v1402_v2  ;;  %v1179_v34 = vsel %vm1163_vm4, %v1146_v0, %v1148_v46  ;;  %v1500_v61 = vsel %vm1484_vm5, %v1467_v28, %v1469_v63 }
 0x21e   :  { %v1181_v43 = vsel %vm1163_vm4, %v4709_v59, %v1146_v0  ;;  %v1502_v49 = vsel %vm1484_vm5, %v4710_v38, %v1467_v28  ;;  %v1405_v54 = vadd.f32 %v1341_v40, %v1179_v34  ;;  %v1725_v46 = vmul.f32 0.25, %v1661_v9  ;;  %v839_v40 = vpop.permute.xlu1 %838  ;;  %v4715_v0 = vld [vmem:[#allocation68_spill] sm:$0xff]  ;;  %v4717_v34 = vld [vmem:[#allocation38_spill] sm:$0xff] }
 0x21f   :  { %v1403_v42 = vadd.f32 %v1339_v32, %v1181_v43  ;;  %v1658_v6 = vadd.f32 %v1502_v49, %v3957_v22  ;;  %v1721_v1 = vmul.f32 0.25, %v1657_v10  ;;  %v1723_v5 = vmul.f32 0.25, %v1659_v3  ;;  %v4716_v10 = vld [vmem:[#allocation64_spill] sm:$0xff]  ;;  %v4718_v43 = vld [vmem:[#allocation95_spill] sm:$0xff] }
 0x220   :  { %v1090_v58 = vmul.f32 0.25, %v1026_v25  ;;  %v4711_v23 = vrot.slane %v3799_v33, 7  ;;  %v1662_v63 = vadd.f32 %v1498_v48, %v1405_v54  ;;  %v869_v31 = vsel %vm842_vm3, %v4706_v41, %v831_v11  ;;  %1789 = vst [vmem:[#allocation5 + $0x180] sm:$0xff] %v1725_v46  ;;  %v4720_v46 = vld [vmem:[#allocation60_spill] sm:$0xff] }
 0x221   :  { %v1660_v16 = vadd.f32 %v1500_v61, %v1403_v42  ;;  %v1722_v20 = vmul.f32 0.25, %v1658_v6  ;;  %1785 = vst [vmem:[#allocation5 + $0x160] sm:$0xff] %v1721_v1  ;;  %v1477_v22 = vrot.slane %v3841_v55, 1  ;;  %v1474_v29 = vrot.slane %v4041_v18, 1  ;;  %v4719_v42 = vld [vmem:[#allocation76_spill] sm:$0xff] }
 0x222   :  { %v1170_v45 = vsel %vm1163_vm4, %v1153_v53, %v4711_v23  ;;  %1787 = vst [vmem:[#allocation5 + $0x170] sm:$0xff] %v1723_v5  ;;  %v1154_v47 = vrot.slane %v1090_v58, 7  ;;  %v1726_v60 = vmul.f32 0.25, %v1662_v63  ;;  %v1475_v48 = vrot.slane %v1090_v58, 1 }
 0x223   :  { %v4083_v7 = vadd.f32 %v3852_v14, %v1170_v45  ;;  %v1724_v24 = vmul.f32 0.25, %v1660_v16  ;;  %1786 = vst [vmem:[#allocation5 + $0x168] sm:$0xff] %v1722_v20  ;;  %v960_v2 = vmul.f32 %v2942_v35, %v901_v36  ;;  %v4712_v11 = vrot.slane %v3841_v55, 7 }
 0x224   :  { %v4713_v62 = vrot.slane %v3799_v33, 1  ;;  %v1023_v21 = vadd.f32 %v869_v31, %v4714_v39  ;;  %v873_v32 = vsel %vm842_vm3, %v4715_v0, %v839_v40  ;;  %v1492_v28 = vsel %vm1484_vm5, %v1475_v48, %v1477_v22  ;;  %1790 = vst [vmem:[#allocation5 + $0x188] sm:$0xff] %v1726_v60 }
 0x225   :  { %v1171_v41 = vsel %vm1163_vm4, %v1154_v47, %v4712_v11  ;;  %1788 = vst [vmem:[#allocation5 + $0x178] sm:$0xff] %v1724_v24  ;;  %v1024_v3 = vadd.f32 %v960_v2, %v4716_v10  ;;  %v905_v9 = vsel %vm842_vm3, %v839_v40, %v4715_v0  ;;  %v1031_v59 = vadd.f32 %v873_v32, %v4717_v34 }
 0x226   :  { %v1491_v14 = vsel %vm1484_vm5, %v1474_v29, %v4713_v62  ;;  %v4100_v36 = vadd.f32 %v3855_v15, %v1171_v41  ;;  %v1087_v27 = vmul.f32 0.25, %v1023_v21  ;;  %v968_v25 = vmul.f32 %v2942_v35, %v905_v9 }
 0x227   :  { %v872_v15 = vsel %vm842_vm3, %v4718_v43, %v837_v30  ;;  %v1346_v61 = vmul.f32 2.0, %v4041_v18  ;;  %v1347_v38 = vmul.f32 2.0, %v1090_v58  ;;  %v1088_v49 = vmul.f32 0.25, %v1024_v3 }
 0x228   :  { %v1029_v54 = vadd.f32 %v872_v15, %v4719_v42  ;;  %v1151_v6 = vrot.slane %v1087_v27, 7  ;;  %v1344_v1 = vmul.f32 2.0, %v1087_v27  ;;  %v1472_v5 = vrot.slane %v1087_v27, 1 }
 0x229   :  { %v1032_v23 = vadd.f32 %v968_v25, %v4720_v46  ;;  %v1152_v45 = vrot.slane %v1088_v49, 7  ;;  %v1345_v16 = vmul.f32 2.0, %v1088_v49  ;;  %v1473_v63 = vrot.slane %v1088_v49, 1 }
 0x22a   :  { %v4118_v20 = vmul.f32 0.25, %v1031_v59  ;;  %v1172_v31 = vsel %vm1163_vm4, %v1151_v6, %v1153_v53  ;;  %v1174_v18 = vsel %vm1163_vm4, %v1149_v44, %v1151_v6  ;;  %v1493_v58 = vsel %vm1484_vm5, %v1472_v5, %v1474_v29 }
 0x22b   :  { %v4721_v40 = vrot.slane %v3730_v8, 1  ;;  %v1173_v60 = vsel %vm1163_vm4, %v1152_v45, %v1154_v47  ;;  %v4722_v2 = vrot.slane %v3743_v17, 7  ;;  %v1408_v11 = vadd.f32 %v1344_v1, %v1174_v18 }
 0x22c   :  { %v1410_v41 = vadd.f32 %v1346_v61, %v1172_v31  ;;  %v1411_v44 = vadd.f32 %v1347_v38, %v1173_v60  ;;  %v1494_v29 = vsel %vm1484_vm5, %v1473_v63, %v1475_v48  ;;  %v4723_v8 = vrot.slane %v3743_v17, 1 }
 0x22d   :  { %v1495_v24 = vsel %vm1484_vm5, %v4721_v40, %v1472_v5  ;;  %v1175_v53 = vsel %vm1163_vm4, %v4722_v2, %v1152_v45  ;;  %v1665_v0 = vadd.f32 %v1493_v58, %v1408_v11  ;;  %v1096_v9 = vmul.f32 0.25, %v1032_v23 }
 0x22e   :  { %v1409_v62 = vadd.f32 %v1345_v16, %v1175_v53  ;;  %v1496_v39 = vsel %vm1484_vm5, %v4723_v8, %v1473_v63  ;;  %v1663_v21 = vadd.f32 %v1495_v24, %v4016_v37  ;;  %v1667_v32 = vadd.f32 %v1491_v14, %v1410_v41 }
 0x22f   :  { %v1664_v47 = vadd.f32 %v1496_v39, %v4025_v26  ;;  %v1668_v3 = vadd.f32 %v1492_v28, %v1411_v44  ;;  %v1159_v27 = vrot.slane %v4118_v20, 7  ;;  %v1729_v59 = vmul.f32 0.25, %v1665_v0 }
 0x230   :  { %v1666_v10 = vadd.f32 %v1494_v29, %v1409_v62  ;;  %v1727_v25 = vmul.f32 0.25, %v1663_v21  ;;  %v904_v17 = vsel %vm842_vm3, %v837_v30, %v4718_v43  ;;  %v1612_v48 = vmul.f32 %v3656_v56, %v3751_v50 }
 0x231   :  { %v1728_v34 = vmul.f32 0.25, %v1664_v47  ;;  %v1160_v15 = vrot.slane %v1096_v9, 7  ;;  %v4724_v26 = vrot.slane %v3640_v19, 7  ;;  %v1731_v28 = vmul.f32 0.25, %v1667_v32  ;;  %1793 = vst [vmem:[#allocation5 + $0x1a0] sm:$0xff] %v1729_v59 }
 0x232   :  { %v1730_v37 = vmul.f32 0.25, %v1666_v10  ;;  %v1732_v61 = vmul.f32 0.25, %v1668_v3  ;;  %1791 = vst [vmem:[#allocation5 + $0x190] sm:$0xff] %v1727_v25  ;;  %v1480_v49 = vrot.slane %v4118_v20, 1  ;;  %v4725_v57 = vrot.slane %v3663_v4, 7 }
 0x233   :  { %v1164_v14 = vsel %vm1163_vm4, %v1159_v27, %v4724_v26  ;;  %1792 = vst [vmem:[#allocation5 + $0x198] sm:$0xff] %v1728_v34  ;;  %v1481_v50 = vrot.slane %v1096_v9, 1  ;;  %v966_v30 = vmul.f32 %v2942_v35, %v904_v17  ;;  %v1093_v43 = vmul.f32 0.25, %v1029_v54  ;;  %v4728_v35 = vld [vmem:[#allocation58_spill] sm:$0xff] }
 0x234   :  { %v1418_v38 = vadd.f32 %v3677_v52, %v1164_v14  ;;  %v1165_v56 = vsel %vm1163_vm4, %v1160_v15, %v4725_v57  ;;  %v1352_v42 = vmul.f32 2.0, %v4118_v20  ;;  %v4726_v1 = vrot.slane %v3640_v19, 1  ;;  %1794 = vst [vmem:[#allocation5 + $0x1a8] sm:$0xff] %v1730_v37 }
 0x235   :  { %v1419_v6 = vadd.f32 %v3702_v12, %v1165_v56  ;;  %v4727_v46 = vrot.slane %v3663_v4, 1  ;;  %v1030_v54 = vadd.f32 %v966_v30, %v4728_v35  ;;  %v1157_v45 = vrot.slane %v1093_v43, 7  ;;  %1795 = vst [vmem:[#allocation5 + $0x1b0] sm:$0xff] %v1731_v28 }
 0x236   :  { %v1485_v52 = vsel %vm1484_vm5, %v1480_v49, %v4726_v1  ;;  %v1675_v5 = vadd.f32 %v3754_v51, %v1418_v38  ;;  %v1350_v16 = vmul.f32 2.0, %v1093_v43  ;;  %v1478_v20 = vrot.slane %v1093_v43, 1  ;;  %1796 = vst [vmem:[#allocation5 + $0x1b8] sm:$0xff] %v1732_v61 }
 0x237   :  { %v1486_v23 = vsel %vm1484_vm5, %v1481_v50, %v4727_v46  ;;  %v1676_v63 = vadd.f32 %v1612_v48, %v1419_v6  ;;  %v1353_v19 = vmul.f32 2.0, %v1096_v9  ;;  %v1094_v31 = vmul.f32 0.25, %v1030_v54 }
 0x238   :  { %v1739_v12 = vmul.f32 0.25, %v1675_v5  ;;  %v1166_v51 = vsel %vm1163_vm4, %v1157_v45, %v1159_v27  ;;  %v4729_v18 = vrot.slane %v3799_v33, 7  ;;  %v1487_v60 = vsel %vm1484_vm5, %v1478_v20, %v1480_v49 }
 0x239   :  { %v1740_v58 = vmul.f32 0.25, %v1676_v63  ;;  %v1416_v24 = vadd.f32 %v1352_v42, %v1166_v51  ;;  %v1158_v2 = vrot.slane %v1094_v31, 7  ;;  %v1351_v53 = vmul.f32 2.0, %v1094_v31 }
 0x23a   :  { %v1168_v4 = vsel %vm1163_vm4, %v4729_v18, %v1157_v45  ;;  %1803 = vst [vmem:[#allocation5 + $0x1f0] sm:$0xff] %v1739_v12  ;;  %v1479_v11 = vrot.slane %v1094_v31, 1  ;;  %v4730_v41 = vrot.slane %v3799_v33, 1  ;;  %v4731_v21 = vrot.slane %v3841_v55, 7 }
 0x23b   :  { %v1414_v40 = vadd.f32 %v1350_v16, %v1168_v4  ;;  %1804 = vst [vmem:[#allocation5 + $0x1f8] sm:$0xff] %v1740_v58  ;;  %v1673_v8 = vadd.f32 %v1485_v52, %v1416_v24  ;;  %v1167_v39 = vsel %vm1163_vm4, %v1158_v2, %v1160_v15 }
 0x23c   :  { %v1489_v62 = vsel %vm1484_vm5, %v4730_v41, %v1478_v20  ;;  %v1169_v47 = vsel %vm1163_vm4, %v4731_v21, %v1158_v2  ;;  %v1488_v0 = vsel %vm1484_vm5, %v1479_v11, %v1481_v50  ;;  %v1490_v33 = vsel %vm1484_vm5, %v1477_v22, %v1479_v11 }
 0x23d   :  { %v1669_v44 = vadd.f32 %v1489_v62, %v4083_v7  ;;  %v1671_v29 = vadd.f32 %v1487_v60, %v1414_v40  ;;  %v1415_v32 = vadd.f32 %v1351_v53, %v1169_v47  ;;  %v1417_v7 = vadd.f32 %v1353_v19, %v1167_v39 }
 0x23e   :  { %v1670_v10 = vadd.f32 %v1490_v33, %v4100_v36  ;;  %v1737_v27 = vmul.f32 0.25, %v1673_v8 }
 0x23f   :  { %v1733_v3 = vmul.f32 0.25, %v1669_v44  ;;  %v1735_v9 = vmul.f32 0.25, %v1671_v29  ;;  %v1672_v25 = vadd.f32 %v1488_v0, %v1415_v32  ;;  %v1674_v34 = vadd.f32 %v1486_v23, %v1417_v7 }
 0x240   :  { %v1734_v59 = vmul.f32 0.25, %v1670_v10  ;;  %1801 = vst [vmem:[#allocation5 + $0x1e0] sm:$0xff] %v1737_v27 }
 0x241   :  { %1797 = vst [vmem:[#allocation5 + $0x1c0] sm:$0xff] %v1733_v3  ;;  %v1736_v13 = vmul.f32 0.25, %v1672_v25  ;;  %v1738_v55 = vmul.f32 0.25, %v1674_v34 }
 0x242   :  { %1799 = vst [vmem:[#allocation5 + $0x1d0] sm:$0xff] %v1735_v9 }
 0x243   :  { %1798 = vst [vmem:[#allocation5 + $0x1c8] sm:$0xff] %v1734_v59 }
 0x244   :  { %1800 = vst [vmem:[#allocation5 + $0x1d8] sm:$0xff] %v1736_v13 }
 0x245   :  { %1802 = vst [vmem:[#allocation5 + $0x1e8] sm:$0xff] %v1738_v55 }
 0x246   :  { %1817 = dma.vmem_to_hbm [thread:$0]  %s1810_s15, 8192, %s1812_s18, [#allocation4], %s1888_s11, %s1888_s11, %s1889_s12  }
 0x247   :  { %1885 = dma.done.wait [#allocation4], 8192  }
 0x248   :  { %1886 = vsyncadd [#allocation4], 4294959104 }
 0x249   :  { %1822 = vsyncpa [#allocation3], 1 }
 0x24a   :  { %1823 = vsyncpa [#allocation4], 1 }

</bundles_post_ra>
